<compile_context>
chip_gen: v6e
topology: v6e:2x2x1
jax: 0.10.0
libtpu: 0.0.40
codegen_flags: <defaults>
</compile_context>

<pallas_src>
import functools

import jax
import jax.numpy as jnp
from jax.experimental import pallas as pl
from jax.experimental.pallas import tpu as pltpu


def _round_up(n, m):
    return ((n + m - 1) // m) * m


# ----------------------------------------------------------------------------
# Fused Pallas kernel: entire NHITS forward (all stacks / blocks), weights
# resident in VMEM, one grid step per batch tile.
# ----------------------------------------------------------------------------
def nhits_resident_kernel(x_ref, w1_ref, b1_ref, w2_ref, b2_ref, wf_ref, bf_ref,
                          sum_ref, blk_ref, *, pool_ks, inv_ratios, pooled_w):
    num_blocks = len(pool_ks)
    cdt = w1_ref.dtype          # MXU input dtype (bf16 or f32); accumulation is f32

    res = x_ref[...].astype(jnp.float32)       # (B_tile, Lp) residual carry
    total = jnp.zeros_like(res)                # final-output accumulator

    for i in range(num_blocks):                # static unroll over blocks
        pk = pool_ks[i]

        # MaxPool1d(kernel=pk, stride=1, padding=0): running max over static
        # left-shifted slices of shared width pooled_w = Lp - max_pk + 1.
        # Pooled positions >= this block's true pooled length feed zero rows
        # of W1, so their (garbage) values are irrelevant.
        pooled = res[:, 0:pooled_w]
        for j in range(1, pk):
            pooled = jnp.maximum(pooled, res[:, j:j + pooled_w])

        # MLP: Linear -> ReLU -> Linear -> ReLU -> (Linear ∘ projection, fused).
        h = jnp.dot(pooled.astype(cdt), w1_ref[i],
                    preferred_element_type=jnp.float32) + b1_ref[i]
        h = jnp.maximum(h, 0.0)
        h = jnp.dot(h.astype(cdt), w2_ref[i],
                    preferred_element_type=jnp.float32) + b2_ref[i]
        h = jnp.maximum(h, 0.0)
        proj = jnp.dot(h.astype(cdt), wf_ref[i],
                       preferred_element_type=jnp.float32) + bf_ref[i]

        blk_ref[i] = proj                                  # this block's output
        total = total + proj                               # final-output sum
        res = res - proj * jnp.float32(inv_ratios[i])      # residual update (mul, not div)

    sum_ref[...] = total


# ----------------------------------------------------------------------------
# Wrapper: fuse/pad/stack parameters and invoke the single fused pallas_call.
# ----------------------------------------------------------------------------
def nhits_forward(x, all_params, pooling_kernel_sizes, expressiveness_ratios,
                  output_size, hidden_size, *, param_dtype=jnp.bfloat16,
                  batch_tile=256):
    """Fused NHITS forward.  Returns (final_output[:, :output_size], block_outputs)."""
    B, input_size = x.shape
    stacks = len(all_params)
    blocks_per_stack = len(all_params[0])
    num_blocks = stacks * blocks_per_stack

    # Static per-block hyperparameters (baked into the unrolled kernel trace).
    pool_ks = tuple(int(pooling_kernel_sizes[s])
                    for s in range(stacks) for _ in range(blocks_per_stack))
    inv_ratios = tuple(1.0 / float(expressiveness_ratios[s])
                       for s in range(stacks) for _ in range(blocks_per_stack))
    max_pk = max(pool_ks)

    # Lane-dense padded dims (multiples of 128), sublane-dense batch tile.
    Lp = _round_up(input_size + max_pk - 1, 128)    # residual / projection width
    Hp = _round_up(hidden_size, 128)                # hidden width
    pooled_w = Lp - max_pk + 1                      # shared pooled width (>= any true pooled len)

    B_pad8 = _round_up(max(B, 8), 8)
    B_tile = min(_round_up(batch_tile, 8), B_pad8)  # re-derive smaller for v7x 64 MiB if needed
    B_pad = _round_up(B_pad8, B_tile)
    n_bt = B_pad // B_tile

    # --- Parameter prep: fuse w3@wp, zero-pad, stack along a block axis. ---
    def pad2(a, r, c):
        return jnp.zeros((r, c), jnp.float32).at[:a.shape[0], :a.shape[1]].set(
            a.astype(jnp.float32))

    hi = jax.lax.Precision.HIGHEST   # exact-f32 host-side fusion (one-time cost)
    w1s, b1s, w2s, b2s, wfs, bfs = [], [], [], [], [], []
    for stack_params in all_params:
        for (w1, b1, w2, b2, w3, b3, wp, bp) in stack_params:
            wf = jnp.dot(w3, wp, precision=hi)            # (hidden, input)
            bf = jnp.dot(b3, wp, precision=hi) + bp       # (1, input)
            w1s.append(pad2(w1, pooled_w, Hp))
            b1s.append(pad2(b1, 1, Hp))
            w2s.append(pad2(w2, Hp, Hp))
            b2s.append(pad2(b2, 1, Hp))
            wfs.append(pad2(wf, Hp, Lp))
            bfs.append(pad2(bf, 1, Lp))

    w1_st = jnp.stack(w1s).astype(param_dtype)
    w2_st = jnp.stack(w2s).astype(param_dtype)
    wf_st = jnp.stack(wfs).astype(param_dtype)
    b1_st = jnp.stack(b1s)                 # biases stay f32 (added after f32 accumulation)
    b2_st = jnp.stack(b2s)
    bf_st = jnp.stack(bfs)

    x_pad = jnp.zeros((B_pad, Lp), jnp.float32).at[:B, :input_size].set(x)

    kernel = functools.partial(nhits_resident_kernel, pool_ks=pool_ks,
                               inv_ratios=inv_ratios, pooled_w=pooled_w)

    grid_spec = pltpu.PrefetchScalarGridSpec(
        num_scalar_prefetch=0,
        grid=(n_bt,),                                            # batch tiles only
        in_specs=[
            pl.BlockSpec((B_tile, Lp), lambda t: (t, 0)),                  # x tile
            pl.BlockSpec((num_blocks, pooled_w, Hp), lambda t: (0, 0, 0)),  # w1 (resident)
            pl.BlockSpec((num_blocks, 1, Hp), lambda t: (0, 0, 0)),         # b1
            pl.BlockSpec((num_blocks, Hp, Hp), lambda t: (0, 0, 0)),        # w2
            pl.BlockSpec((num_blocks, 1, Hp), lambda t: (0, 0, 0)),         # b2
            pl.BlockSpec((num_blocks, Hp, Lp), lambda t: (0, 0, 0)),        # fused w3@wp
            pl.BlockSpec((num_blocks, 1, Lp), lambda t: (0, 0, 0)),         # fused bias
        ],
        out_specs=[
            pl.BlockSpec((B_tile, Lp), lambda t: (t, 0)),                  # final sum tile
            pl.BlockSpec((num_blocks, B_tile, Lp), lambda t: (0, t, 0)),   # per-block outputs
        ],
    )

    # Explicit VMEM budget from the actual resident footprint (+2x headroom for
    # double-buffering), clamped to stay safe on v7x's 64 MiB physical VMEM.
    itemsize = jnp.dtype(param_dtype).itemsize
    resident_bytes = ((w1_st.size + w2_st.size + wf_st.size) * itemsize
                      + (b1_st.size + b2_st.size + bf_st.size) * 4
                      + 2 * B_tile * Lp * 4
                      + num_blocks * B_tile * Lp * 4)
    vmem_limit = int(min(max(2 * resident_bytes, 16 * 1024 * 1024),
                         64 * 1024 * 1024))

    sum_out, blk_out = pl.pallas_call(
        kernel,
        out_shape=(jax.ShapeDtypeStruct((B_pad, Lp), jnp.float32),
                   jax.ShapeDtypeStruct((num_blocks, B_pad, Lp), jnp.float32)),
        grid_spec=grid_spec,
        compiler_params=pltpu.CompilerParams(
            dimension_semantics=("parallel",),        # batch tiles are independent
            vmem_limit_bytes=vmem_limit),
    )(x_pad, w1_st, b1_st, w2_st, b2_st, wf_st, bf_st)

    final = sum_out[:B, :output_size]
    block_outputs = [blk_out[i, :B, :input_size] for i in range(num_blocks)]
    return final, block_outputs


# ----------------------------------------------------------------------------
# Deterministic parameter construction (synthetic, not a checkpoint load)
# ----------------------------------------------------------------------------
def make_params(key, input_size, output_size, hidden_size,
                pooling_kernel_sizes, blocks_per_stack):
    all_params = []
    for pool_k in pooling_kernel_sizes:
        pooled_size = input_size - pool_k + 1
        stack_params = []
        for _ in range(blocks_per_stack):
            key, *ks = jax.random.split(key, 9)
            scale = 0.1
            w1 = scale * jax.random.normal(ks[0], (pooled_size, hidden_size), jnp.float32)
            b1 = scale * jax.random.normal(ks[1], (1, hidden_size), jnp.float32)
            w2 = scale * jax.random.normal(ks[2], (hidden_size, hidden_size), jnp.float32)
            b2 = scale * jax.random.normal(ks[3], (1, hidden_size), jnp.float32)
            w3 = scale * jax.random.normal(ks[4], (hidden_size, output_size), jnp.float32)
            b3 = scale * jax.random.normal(ks[5], (1, output_size), jnp.float32)
            wp = scale * jax.random.normal(ks[6], (output_size, input_size), jnp.float32)
            bp = scale * jax.random.normal(ks[7], (1, input_size), jnp.float32)
            stack_params.append((w1, b1, w2, b2, w3, b3, wp, bp))
        all_params.append(stack_params)
    return all_params


# ----------------------------------------------------------------------------
# Pure-JAX reference (mirrors the PyTorch forward) for correctness check
# ----------------------------------------------------------------------------
def ref_block(x, params, pool_k, ratio):
    w1, b1, w2, b2, w3, b3, wp, bp = params
    L = x.shape[1]
    pooled_len = L - pool_k + 1
    pooled = x[:, 0:pooled_len]
    for j in range(1, pool_k):
        pooled = jnp.maximum(pooled, x[:, j:j + pooled_len])
    h = jnp.maximum(pooled @ w1 + b1, 0.0)
    h = jnp.maximum(h @ w2 + b2, 0.0)
    y = h @ w3 + b3
    proj = y @ wp + bp
    return proj, x - proj / ratio


def ref_forward(x, all_params, pooling_kernel_sizes, expressiveness_ratios,
                output_size):
    residual = x
    outs = []
    for s, stack_params in enumerate(all_params):
        for bp_ in stack_params:
            o, residual = ref_block(residual, bp_, pooling_kernel_sizes[s],
                                    expressiveness_ratios[s])
            outs.append(o)
    final = jnp.sum(jnp.stack(outs, axis=0), axis=0)
    return final[:, :output_size], outs


if __name__ == "__main__":
    # Small, deterministic configuration consistent with the module signature.
    batch = 4
    input_size = 16
    output_size = 8
    stacks = 2
    blocks_per_stack = 2
    pooling_kernel_sizes = [2, 3]
    hidden_size = 32
    expressiveness_ratios = [1.0, 2.0]
    # NOTE: dropout_rate in the PyTorch __init__ is never used in its MLP, and
    # the dynamic projection re-creation in NHITSBlock.forward is dead code
    # (the MLP output width always equals projection.in_features), so neither
    # needs translation.

    root = jax.random.PRNGKey(0)
    k_params, k_x = jax.random.split(root)
    all_params = make_params(k_params, input_size, output_size, hidden_size,
                             pooling_kernel_sizes, blocks_per_stack)
    x = jax.random.normal(k_x, (batch, input_size), jnp.float32)

    ref_final, ref_outs = ref_forward(
        x, all_params, pooling_kernel_sizes, expressiveness_ratios, output_size)

    # 1) Exact-semantics check: f32 weights, tight tolerance.
    final_f32, blocks_f32 = nhits_forward(
        x, all_params, pooling_kernel_sizes, expressiveness_ratios,
        output_size, hidden_size, param_dtype=jnp.float32)
    jax.block_until_ready(final_f32)
    assert final_f32.shape == (batch, output_size)
    assert len(blocks_f32) == stacks * blocks_per_stack
    assert jnp.allclose(final_f32, ref_final, atol=1e-3, rtol=1e-3)
    for a, b in zip(blocks_f32, ref_outs):
        assert jnp.allclose(a, b, atol=1e-3, rtol=1e-3)

    # 2) Optimized path: bf16 weight storage / MXU inputs (f32 accumulation),
    #    relaxed tolerance as flagged in the review.
    final_bf, blocks_bf = nhits_forward(
        x, all_params, pooling_kernel_sizes, expressiveness_ratios,
        output_size, hidden_size, param_dtype=jnp.bfloat16)
    jax.block_until_ready(final_bf)
    assert final_bf.shape == (batch, output_size)
    assert jnp.allclose(final_bf, ref_final, atol=5e-2, rtol=5e-2)
    for a, b in zip(blocks_bf, ref_outs):
        assert jnp.allclose(a, b, atol=5e-2, rtol=5e-2)

    print("KERNEL_OK")
</pallas_src>

<mosaic_0001>
module attributes {stable_mosaic.version = 11 : i64} {
  func.func @nhits_resident_kernel(%arg0: i32, %arg1: memref<8x128xf32, #tpu.memory_space<vmem>>, %arg2: memref<4x126x128xf32, #tpu.memory_space<vmem>>, %arg3: memref<4x1x128xf32, #tpu.memory_space<vmem>>, %arg4: memref<4x128x128xf32, #tpu.memory_space<vmem>>, %arg5: memref<4x1x128xf32, #tpu.memory_space<vmem>>, %arg6: memref<4x128x128xf32, #tpu.memory_space<vmem>>, %arg7: memref<4x1x128xf32, #tpu.memory_space<vmem>>, %arg8: memref<8x128xf32, #tpu.memory_space<vmem>>, %arg9: memref<4x8x128xf32, #tpu.memory_space<vmem>>) attributes {dimension_semantics = [#tpu.dimension_semantics<parallel>], iteration_bounds = array<i64: 1>, scalar_prefetch = 0 : i64, scratch_operands = 0 : i64, tpu.core_type = #tpu.core_type<tc>, window_params = [{transform_indices = @transform_0, window_bounds = array<i64: 8, 128>}, {pipeline_mode = #tpu.pipeline_mode<synchronous>, transform_indices = @transform_1, window_bounds = array<i64: 4, 126, 128>}, {pipeline_mode = #tpu.pipeline_mode<synchronous>, transform_indices = @transform_2, window_bounds = array<i64: 4, 1, 128>}, {pipeline_mode = #tpu.pipeline_mode<synchronous>, transform_indices = @transform_3, window_bounds = array<i64: 4, 128, 128>}, {pipeline_mode = #tpu.pipeline_mode<synchronous>, transform_indices = @transform_4, window_bounds = array<i64: 4, 1, 128>}, {pipeline_mode = #tpu.pipeline_mode<synchronous>, transform_indices = @transform_5, window_bounds = array<i64: 4, 128, 128>}, {pipeline_mode = #tpu.pipeline_mode<synchronous>, transform_indices = @transform_6, window_bounds = array<i64: 4, 1, 128>}, {transform_indices = @transform_7, window_bounds = array<i64: 8, 128>}, {transform_indices = @transform_8, window_bounds = array<i64: 4, 8, 128>}]} {
    %c0 = arith.constant 0 : index
    %c0_0 = arith.constant 0 : index
    %0 = vector.load %arg1[%c0, %c0_0] : memref<8x128xf32, #tpu.memory_space<vmem>>, vector<8x128xf32>
    %cst = arith.constant 0.000000e+00 : f32
    %1 = vector.broadcast %cst : f32 to vector<8x128xf32>
    %2 = vector.extract_strided_slice %0 {offsets = [0, 0], sizes = [8, 126], strides = [1, 1]} : vector<8x128xf32> to vector<8x126xf32>
    %3 = vector.extract_strided_slice %0 {offsets = [0, 1], sizes = [8, 126], strides = [1, 1]} : vector<8x128xf32> to vector<8x126xf32>
    %4 = arith.maximumf %2, %3 : vector<8x126xf32>
    %c0_1 = arith.constant 0 : index
    %c0_2 = arith.constant 0 : index
    %c0_3 = arith.constant 0 : index
    %5 = vector.load %arg2[%c0_1, %c0_2, %c0_3] : memref<4x126x128xf32, #tpu.memory_space<vmem>>, vector<1x126x128xf32>
    %6 = vector.shape_cast %5 : vector<1x126x128xf32> to vector<126x128xf32>
    %cst_4 = arith.constant dense<0.000000e+00> : vector<8x128xf32>
    %7 = tpu.matmul %4, %6, %cst_4 {dimension_numbers = #tpu.dot_dimension_numbers<[1], [0], [0], [1], [0, 0, 1, 1], [], []>} : vector<8x126xf32>, vector<126x128xf32>, vector<8x128xf32> -> vector<8x128xf32>
    %c0_5 = arith.constant 0 : index
    %c0_6 = arith.constant 0 : index
    %c0_7 = arith.constant 0 : index
    %8 = vector.load %arg3[%c0_5, %c0_6, %c0_7] : memref<4x1x128xf32, #tpu.memory_space<vmem>>, vector<1x1x128xf32>
    %9 = vector.shape_cast %8 : vector<1x1x128xf32> to vector<1x128xf32>
    %10 = vector.broadcast %9 : vector<1x128xf32> to vector<8x128xf32>
    %11 = arith.addf %7, %10 : vector<8x128xf32>
    %cst_8 = arith.constant 0.000000e+00 : f32
    %12 = vector.broadcast %cst_8 : f32 to vector<8x128xf32>
    %13 = arith.maximumf %11, %12 : vector<8x128xf32>
    %c0_9 = arith.constant 0 : index
    %c0_10 = arith.constant 0 : index
    %c0_11 = arith.constant 0 : index
    %14 = vector.load %arg4[%c0_9, %c0_10, %c0_11] : memref<4x128x128xf32, #tpu.memory_space<vmem>>, vector<1x128x128xf32>
    %15 = vector.shape_cast %14 : vector<1x128x128xf32> to vector<128x128xf32>
    %cst_12 = arith.constant dense<0.000000e+00> : vector<8x128xf32>
    %16 = tpu.matmul %13, %15, %cst_12 {dimension_numbers = #tpu.dot_dimension_numbers<[1], [0], [0], [1], [0, 0, 1, 1], [], []>} : vector<8x128xf32>, vector<128x128xf32>, vector<8x128xf32> -> vector<8x128xf32>
    %c0_13 = arith.constant 0 : index
    %c0_14 = arith.constant 0 : index
    %c0_15 = arith.constant 0 : index
    %17 = vector.load %arg5[%c0_13, %c0_14, %c0_15] : memref<4x1x128xf32, #tpu.memory_space<vmem>>, vector<1x1x128xf32>
    %18 = vector.shape_cast %17 : vector<1x1x128xf32> to vector<1x128xf32>
    %19 = vector.broadcast %18 : vector<1x128xf32> to vector<8x128xf32>
    %20 = arith.addf %16, %19 : vector<8x128xf32>
    %cst_16 = arith.constant 0.000000e+00 : f32
    %21 = vector.broadcast %cst_16 : f32 to vector<8x128xf32>
    %22 = arith.maximumf %20, %21 : vector<8x128xf32>
    %c0_17 = arith.constant 0 : index
    %c0_18 = arith.constant 0 : index
    %c0_19 = arith.constant 0 : index
    %23 = vector.load %arg6[%c0_17, %c0_18, %c0_19] : memref<4x128x128xf32, #tpu.memory_space<vmem>>, vector<1x128x128xf32>
    %24 = vector.shape_cast %23 : vector<1x128x128xf32> to vector<128x128xf32>
    %cst_20 = arith.constant dense<0.000000e+00> : vector<8x128xf32>
    %25 = tpu.matmul %22, %24, %cst_20 {dimension_numbers = #tpu.dot_dimension_numbers<[1], [0], [0], [1], [0, 0, 1, 1], [], []>} : vector<8x128xf32>, vector<128x128xf32>, vector<8x128xf32> -> vector<8x128xf32>
    %c0_21 = arith.constant 0 : index
    %c0_22 = arith.constant 0 : index
    %c0_23 = arith.constant 0 : index
    %26 = vector.load %arg7[%c0_21, %c0_22, %c0_23] : memref<4x1x128xf32, #tpu.memory_space<vmem>>, vector<1x1x128xf32>
    %27 = vector.shape_cast %26 : vector<1x1x128xf32> to vector<1x128xf32>
    %28 = vector.broadcast %27 : vector<1x128xf32> to vector<8x128xf32>
    %29 = arith.addf %25, %28 : vector<8x128xf32>
    %c0_24 = arith.constant 0 : index
    %c0_25 = arith.constant 0 : index
    %c0_26 = arith.constant 0 : index
    %30 = vector.load %arg9[%c0_24, %c0_25, %c0_26] : memref<4x8x128xf32, #tpu.memory_space<vmem>>, vector<1x8x128xf32>
    %31 = vector.shape_cast %30 : vector<1x8x128xf32> to vector<8x128xf32>
    %32 = vector.shape_cast %29 : vector<8x128xf32> to vector<1x8x128xf32>
    tpu.vector_store %arg9[%c0_24, %c0_25, %c0_26], %32 {strides = array<i32>} : memref<4x8x128xf32, #tpu.memory_space<vmem>>, vector<1x8x128xf32>,
    %33 = arith.addf %1, %29 : vector<8x128xf32>
    %cst_27 = arith.constant 1.000000e+00 : f32
    %34 = vector.broadcast %cst_27 : f32 to vector<8x128xf32>
    %35 = arith.mulf %29, %34 : vector<8x128xf32>
    %36 = arith.subf %0, %35 : vector<8x128xf32>
    %37 = vector.extract_strided_slice %36 {offsets = [0, 0], sizes = [8, 126], strides = [1, 1]} : vector<8x128xf32> to vector<8x126xf32>
    %38 = vector.extract_strided_slice %36 {offsets = [0, 1], sizes = [8, 126], strides = [1, 1]} : vector<8x128xf32> to vector<8x126xf32>
    %39 = arith.maximumf %37, %38 : vector<8x126xf32>
    %c1 = arith.constant 1 : index
    %c0_28 = arith.constant 0 : index
    %c0_29 = arith.constant 0 : index
    %40 = vector.load %arg2[%c1, %c0_28, %c0_29] : memref<4x126x128xf32, #tpu.memory_space<vmem>>, vector<1x126x128xf32>
    %41 = vector.shape_cast %40 : vector<1x126x128xf32> to vector<126x128xf32>
    %cst_30 = arith.constant dense<0.000000e+00> : vector<8x128xf32>
    %42 = tpu.matmul %39, %41, %cst_30 {dimension_numbers = #tpu.dot_dimension_numbers<[1], [0], [0], [1], [0, 0, 1, 1], [], []>} : vector<8x126xf32>, vector<126x128xf32>, vector<8x128xf32> -> vector<8x128xf32>
    %c1_31 = arith.constant 1 : index
    %c0_32 = arith.constant 0 : index
    %c0_33 = arith.constant 0 : index
    %43 = vector.load %arg3[%c1_31, %c0_32, %c0_33] : memref<4x1x128xf32, #tpu.memory_space<vmem>>, vector<1x1x128xf32>
    %44 = vector.shape_cast %43 : vector<1x1x128xf32> to vector<1x128xf32>
    %45 = vector.broadcast %44 : vector<1x128xf32> to vector<8x128xf32>
    %46 = arith.addf %42, %45 : vector<8x128xf32>
    %cst_34 = arith.constant 0.000000e+00 : f32
    %47 = vector.broadcast %cst_34 : f32 to vector<8x128xf32>
    %48 = arith.maximumf %46, %47 : vector<8x128xf32>
    %c1_35 = arith.constant 1 : index
    %c0_36 = arith.constant 0 : index
    %c0_37 = arith.constant 0 : index
    %49 = vector.load %arg4[%c1_35, %c0_36, %c0_37] : memref<4x128x128xf32, #tpu.memory_space<vmem>>, vector<1x128x128xf32>
    %50 = vector.shape_cast %49 : vector<1x128x128xf32> to vector<128x128xf32>
    %cst_38 = arith.constant dense<0.000000e+00> : vector<8x128xf32>
    %51 = tpu.matmul %48, %50, %cst_38 {dimension_numbers = #tpu.dot_dimension_numbers<[1], [0], [0], [1], [0, 0, 1, 1], [], []>} : vector<8x128xf32>, vector<128x128xf32>, vector<8x128xf32> -> vector<8x128xf32>
    %c1_39 = arith.constant 1 : index
    %c0_40 = arith.constant 0 : index
    %c0_41 = arith.constant 0 : index
    %52 = vector.load %arg5[%c1_39, %c0_40, %c0_41] : memref<4x1x128xf32, #tpu.memory_space<vmem>>, vector<1x1x128xf32>
    %53 = vector.shape_cast %52 : vector<1x1x128xf32> to vector<1x128xf32>
    %54 = vector.broadcast %53 : vector<1x128xf32> to vector<8x128xf32>
    %55 = arith.addf %51, %54 : vector<8x128xf32>
    %cst_42 = arith.constant 0.000000e+00 : f32
    %56 = vector.broadcast %cst_42 : f32 to vector<8x128xf32>
    %57 = arith.maximumf %55, %56 : vector<8x128xf32>
    %c1_43 = arith.constant 1 : index
    %c0_44 = arith.constant 0 : index
    %c0_45 = arith.constant 0 : index
    %58 = vector.load %arg6[%c1_43, %c0_44, %c0_45] : memref<4x128x128xf32, #tpu.memory_space<vmem>>, vector<1x128x128xf32>
    %59 = vector.shape_cast %58 : vector<1x128x128xf32> to vector<128x128xf32>
    %cst_46 = arith.constant dense<0.000000e+00> : vector<8x128xf32>
    %60 = tpu.matmul %57, %59, %cst_46 {dimension_numbers = #tpu.dot_dimension_numbers<[1], [0], [0], [1], [0, 0, 1, 1], [], []>} : vector<8x128xf32>, vector<128x128xf32>, vector<8x128xf32> -> vector<8x128xf32>
    %c1_47 = arith.constant 1 : index
    %c0_48 = arith.constant 0 : index
    %c0_49 = arith.constant 0 : index
    %61 = vector.load %arg7[%c1_47, %c0_48, %c0_49] : memref<4x1x128xf32, #tpu.memory_space<vmem>>, vector<1x1x128xf32>
    %62 = vector.shape_cast %61 : vector<1x1x128xf32> to vector<1x128xf32>
    %63 = vector.broadcast %62 : vector<1x128xf32> to vector<8x128xf32>
    %64 = arith.addf %60, %63 : vector<8x128xf32>
    %c1_50 = arith.constant 1 : index
    %c0_51 = arith.constant 0 : index
    %c0_52 = arith.constant 0 : index
    %65 = vector.load %arg9[%c1_50, %c0_51, %c0_52] : memref<4x8x128xf32, #tpu.memory_space<vmem>>, vector<1x8x128xf32>
    %66 = vector.shape_cast %65 : vector<1x8x128xf32> to vector<8x128xf32>
    %67 = vector.shape_cast %64 : vector<8x128xf32> to vector<1x8x128xf32>
    tpu.vector_store %arg9[%c1_50, %c0_51, %c0_52], %67 {strides = array<i32>} : memref<4x8x128xf32, #tpu.memory_space<vmem>>, vector<1x8x128xf32>,
    %68 = arith.addf %33, %64 : vector<8x128xf32>
    %cst_53 = arith.constant 1.000000e+00 : f32
    %69 = vector.broadcast %cst_53 : f32 to vector<8x128xf32>
    %70 = arith.mulf %64, %69 : vector<8x128xf32>
    %71 = arith.subf %36, %70 : vector<8x128xf32>
    %72 = vector.extract_strided_slice %71 {offsets = [0, 0], sizes = [8, 126], strides = [1, 1]} : vector<8x128xf32> to vector<8x126xf32>
    %73 = vector.extract_strided_slice %71 {offsets = [0, 1], sizes = [8, 126], strides = [1, 1]} : vector<8x128xf32> to vector<8x126xf32>
    %74 = arith.maximumf %72, %73 : vector<8x126xf32>
    %75 = vector.extract_strided_slice %71 {offsets = [0, 2], sizes = [8, 126], strides = [1, 1]} : vector<8x128xf32> to vector<8x126xf32>
    %76 = arith.maximumf %74, %75 : vector<8x126xf32>
    %c2 = arith.constant 2 : index
    %c0_54 = arith.constant 0 : index
    %c0_55 = arith.constant 0 : index
    %77 = vector.load %arg2[%c2, %c0_54, %c0_55] : memref<4x126x128xf32, #tpu.memory_space<vmem>>, vector<1x126x128xf32>
    %78 = vector.shape_cast %77 : vector<1x126x128xf32> to vector<126x128xf32>
    %cst_56 = arith.constant dense<0.000000e+00> : vector<8x128xf32>
    %79 = tpu.matmul %76, %78, %cst_56 {dimension_numbers = #tpu.dot_dimension_numbers<[1], [0], [0], [1], [0, 0, 1, 1], [], []>} : vector<8x126xf32>, vector<126x128xf32>, vector<8x128xf32> -> vector<8x128xf32>
    %c2_57 = arith.constant 2 : index
    %c0_58 = arith.constant 0 : index
    %c0_59 = arith.constant 0 : index
    %80 = vector.load %arg3[%c2_57, %c0_58, %c0_59] : memref<4x1x128xf32, #tpu.memory_space<vmem>>, vector<1x1x128xf32>
    %81 = vector.shape_cast %80 : vector<1x1x128xf32> to vector<1x128xf32>
    %82 = vector.broadcast %81 : vector<1x128xf32> to vector<8x128xf32>
    %83 = arith.addf %79, %82 : vector<8x128xf32>
    %cst_60 = arith.constant 0.000000e+00 : f32
    %84 = vector.broadcast %cst_60 : f32 to vector<8x128xf32>
    %85 = arith.maximumf %83, %84 : vector<8x128xf32>
    %c2_61 = arith.constant 2 : index
    %c0_62 = arith.constant 0 : index
    %c0_63 = arith.constant 0 : index
    %86 = vector.load %arg4[%c2_61, %c0_62, %c0_63] : memref<4x128x128xf32, #tpu.memory_space<vmem>>, vector<1x128x128xf32>
    %87 = vector.shape_cast %86 : vector<1x128x128xf32> to vector<128x128xf32>
    %cst_64 = arith.constant dense<0.000000e+00> : vector<8x128xf32>
    %88 = tpu.matmul %85, %87, %cst_64 {dimension_numbers = #tpu.dot_dimension_numbers<[1], [0], [0], [1], [0, 0, 1, 1], [], []>} : vector<8x128xf32>, vector<128x128xf32>, vector<8x128xf32> -> vector<8x128xf32>
    %c2_65 = arith.constant 2 : index
    %c0_66 = arith.constant 0 : index
    %c0_67 = arith.constant 0 : index
    %89 = vector.load %arg5[%c2_65, %c0_66, %c0_67] : memref<4x1x128xf32, #tpu.memory_space<vmem>>, vector<1x1x128xf32>
    %90 = vector.shape_cast %89 : vector<1x1x128xf32> to vector<1x128xf32>
    %91 = vector.broadcast %90 : vector<1x128xf32> to vector<8x128xf32>
    %92 = arith.addf %88, %91 : vector<8x128xf32>
    %cst_68 = arith.constant 0.000000e+00 : f32
    %93 = vector.broadcast %cst_68 : f32 to vector<8x128xf32>
    %94 = arith.maximumf %92, %93 : vector<8x128xf32>
    %c2_69 = arith.constant 2 : index
    %c0_70 = arith.constant 0 : index
    %c0_71 = arith.constant 0 : index
    %95 = vector.load %arg6[%c2_69, %c0_70, %c0_71] : memref<4x128x128xf32, #tpu.memory_space<vmem>>, vector<1x128x128xf32>
    %96 = vector.shape_cast %95 : vector<1x128x128xf32> to vector<128x128xf32>
    %cst_72 = arith.constant dense<0.000000e+00> : vector<8x128xf32>
    %97 = tpu.matmul %94, %96, %cst_72 {dimension_numbers = #tpu.dot_dimension_numbers<[1], [0], [0], [1], [0, 0, 1, 1], [], []>} : vector<8x128xf32>, vector<128x128xf32>, vector<8x128xf32> -> vector<8x128xf32>
    %c2_73 = arith.constant 2 : index
    %c0_74 = arith.constant 0 : index
    %c0_75 = arith.constant 0 : index
    %98 = vector.load %arg7[%c2_73, %c0_74, %c0_75] : memref<4x1x128xf32, #tpu.memory_space<vmem>>, vector<1x1x128xf32>
    %99 = vector.shape_cast %98 : vector<1x1x128xf32> to vector<1x128xf32>
    %100 = vector.broadcast %99 : vector<1x128xf32> to vector<8x128xf32>
    %101 = arith.addf %97, %100 : vector<8x128xf32>
    %c2_76 = arith.constant 2 : index
    %c0_77 = arith.constant 0 : index
    %c0_78 = arith.constant 0 : index
    %102 = vector.load %arg9[%c2_76, %c0_77, %c0_78] : memref<4x8x128xf32, #tpu.memory_space<vmem>>, vector<1x8x128xf32>
    %103 = vector.shape_cast %102 : vector<1x8x128xf32> to vector<8x128xf32>
    %104 = vector.shape_cast %101 : vector<8x128xf32> to vector<1x8x128xf32>
    tpu.vector_store %arg9[%c2_76, %c0_77, %c0_78], %104 {strides = array<i32>} : memref<4x8x128xf32, #tpu.memory_space<vmem>>, vector<1x8x128xf32>,
    %105 = arith.addf %68, %101 : vector<8x128xf32>
    %cst_79 = arith.constant 5.000000e-01 : f32
    %106 = vector.broadcast %cst_79 : f32 to vector<8x128xf32>
    %107 = arith.mulf %101, %106 : vector<8x128xf32>
    %108 = arith.subf %71, %107 : vector<8x128xf32>
    %109 = vector.extract_strided_slice %108 {offsets = [0, 0], sizes = [8, 126], strides = [1, 1]} : vector<8x128xf32> to vector<8x126xf32>
    %110 = vector.extract_strided_slice %108 {offsets = [0, 1], sizes = [8, 126], strides = [1, 1]} : vector<8x128xf32> to vector<8x126xf32>
    %111 = arith.maximumf %109, %110 : vector<8x126xf32>
    %112 = vector.extract_strided_slice %108 {offsets = [0, 2], sizes = [8, 126], strides = [1, 1]} : vector<8x128xf32> to vector<8x126xf32>
    %113 = arith.maximumf %111, %112 : vector<8x126xf32>
    %c3 = arith.constant 3 : index
    %c0_80 = arith.constant 0 : index
    %c0_81 = arith.constant 0 : index
    %114 = vector.load %arg2[%c3, %c0_80, %c0_81] : memref<4x126x128xf32, #tpu.memory_space<vmem>>, vector<1x126x128xf32>
    %115 = vector.shape_cast %114 : vector<1x126x128xf32> to vector<126x128xf32>
    %cst_82 = arith.constant dense<0.000000e+00> : vector<8x128xf32>
    %116 = tpu.matmul %113, %115, %cst_82 {dimension_numbers = #tpu.dot_dimension_numbers<[1], [0], [0], [1], [0, 0, 1, 1], [], []>} : vector<8x126xf32>, vector<126x128xf32>, vector<8x128xf32> -> vector<8x128xf32>
    %c3_83 = arith.constant 3 : index
    %c0_84 = arith.constant 0 : index
    %c0_85 = arith.constant 0 : index
    %117 = vector.load %arg3[%c3_83, %c0_84, %c0_85] : memref<4x1x128xf32, #tpu.memory_space<vmem>>, vector<1x1x128xf32>
    %118 = vector.shape_cast %117 : vector<1x1x128xf32> to vector<1x128xf32>
    %119 = vector.broadcast %118 : vector<1x128xf32> to vector<8x128xf32>
    %120 = arith.addf %116, %119 : vector<8x128xf32>
    %cst_86 = arith.constant 0.000000e+00 : f32
    %121 = vector.broadcast %cst_86 : f32 to vector<8x128xf32>
    %122 = arith.maximumf %120, %121 : vector<8x128xf32>
    %c3_87 = arith.constant 3 : index
    %c0_88 = arith.constant 0 : index
    %c0_89 = arith.constant 0 : index
    %123 = vector.load %arg4[%c3_87, %c0_88, %c0_89] : memref<4x128x128xf32, #tpu.memory_space<vmem>>, vector<1x128x128xf32>
    %124 = vector.shape_cast %123 : vector<1x128x128xf32> to vector<128x128xf32>
    %cst_90 = arith.constant dense<0.000000e+00> : vector<8x128xf32>
    %125 = tpu.matmul %122, %124, %cst_90 {dimension_numbers = #tpu.dot_dimension_numbers<[1], [0], [0], [1], [0, 0, 1, 1], [], []>} : vector<8x128xf32>, vector<128x128xf32>, vector<8x128xf32> -> vector<8x128xf32>
    %c3_91 = arith.constant 3 : index
    %c0_92 = arith.constant 0 : index
    %c0_93 = arith.constant 0 : index
    %126 = vector.load %arg5[%c3_91, %c0_92, %c0_93] : memref<4x1x128xf32, #tpu.memory_space<vmem>>, vector<1x1x128xf32>
    %127 = vector.shape_cast %126 : vector<1x1x128xf32> to vector<1x128xf32>
    %128 = vector.broadcast %127 : vector<1x128xf32> to vector<8x128xf32>
    %129 = arith.addf %125, %128 : vector<8x128xf32>
    %cst_94 = arith.constant 0.000000e+00 : f32
    %130 = vector.broadcast %cst_94 : f32 to vector<8x128xf32>
    %131 = arith.maximumf %129, %130 : vector<8x128xf32>
    %c3_95 = arith.constant 3 : index
    %c0_96 = arith.constant 0 : index
    %c0_97 = arith.constant 0 : index
    %132 = vector.load %arg6[%c3_95, %c0_96, %c0_97] : memref<4x128x128xf32, #tpu.memory_space<vmem>>, vector<1x128x128xf32>
    %133 = vector.shape_cast %132 : vector<1x128x128xf32> to vector<128x128xf32>
    %cst_98 = arith.constant dense<0.000000e+00> : vector<8x128xf32>
    %134 = tpu.matmul %131, %133, %cst_98 {dimension_numbers = #tpu.dot_dimension_numbers<[1], [0], [0], [1], [0, 0, 1, 1], [], []>} : vector<8x128xf32>, vector<128x128xf32>, vector<8x128xf32> -> vector<8x128xf32>
    %c3_99 = arith.constant 3 : index
    %c0_100 = arith.constant 0 : index
    %c0_101 = arith.constant 0 : index
    %135 = vector.load %arg7[%c3_99, %c0_100, %c0_101] : memref<4x1x128xf32, #tpu.memory_space<vmem>>, vector<1x1x128xf32>
    %136 = vector.shape_cast %135 : vector<1x1x128xf32> to vector<1x128xf32>
    %137 = vector.broadcast %136 : vector<1x128xf32> to vector<8x128xf32>
    %138 = arith.addf %134, %137 : vector<8x128xf32>
    %c3_102 = arith.constant 3 : index
    %c0_103 = arith.constant 0 : index
    %c0_104 = arith.constant 0 : index
    %139 = vector.load %arg9[%c3_102, %c0_103, %c0_104] : memref<4x8x128xf32, #tpu.memory_space<vmem>>, vector<1x8x128xf32>
    %140 = vector.shape_cast %139 : vector<1x8x128xf32> to vector<8x128xf32>
    %141 = vector.shape_cast %138 : vector<8x128xf32> to vector<1x8x128xf32>
    tpu.vector_store %arg9[%c3_102, %c0_103, %c0_104], %141 {strides = array<i32>} : memref<4x8x128xf32, #tpu.memory_space<vmem>>, vector<1x8x128xf32>,
    %142 = arith.addf %105, %138 : vector<8x128xf32>
    %c0_105 = arith.constant 0 : index
    %c0_106 = arith.constant 0 : index
    %143 = vector.load %arg8[%c0_105, %c0_106] : memref<8x128xf32, #tpu.memory_space<vmem>>, vector<8x128xf32>
    tpu.vector_store %arg8[%c0_105, %c0_106], %142 {strides = array<i32>} : memref<8x128xf32, #tpu.memory_space<vmem>>, vector<8x128xf32>,
    return
  }
  func.func @transform_0(%arg0: i32) -> (i32, i32) {
    %c0_i32 = arith.constant 0 : i32
    %c0_i32_0 = arith.constant 0 : i32
    return %arg0, %c0_i32 : i32, i32
  }
  func.func @transform_1(%arg0: i32) -> (i32, i32, i32) {
    %c0_i32 = arith.constant 0 : i32
    %c0_i32_0 = arith.constant 0 : i32
    %c0_i32_1 = arith.constant 0 : i32
    %c0_i32_2 = arith.constant 0 : i32
    return %c0_i32, %c0_i32_0, %c0_i32_1 : i32, i32, i32
  }
  func.func @transform_2(%arg0: i32) -> (i32, i32, i32) {
    %c0_i32 = arith.constant 0 : i32
    %c0_i32_0 = arith.constant 0 : i32
    %c0_i32_1 = arith.constant 0 : i32
    %c0_i32_2 = arith.constant 0 : i32
    return %c0_i32, %c0_i32_0, %c0_i32_1 : i32, i32, i32
  }
  func.func @transform_3(%arg0: i32) -> (i32, i32, i32) {
    %c0_i32 = arith.constant 0 : i32
    %c0_i32_0 = arith.constant 0 : i32
    %c0_i32_1 = arith.constant 0 : i32
    %c0_i32_2 = arith.constant 0 : i32
    return %c0_i32, %c0_i32_0, %c0_i32_1 : i32, i32, i32
  }
  func.func @transform_4(%arg0: i32) -> (i32, i32, i32) {
    %c0_i32 = arith.constant 0 : i32
    %c0_i32_0 = arith.constant 0 : i32
    %c0_i32_1 = arith.constant 0 : i32
    %c0_i32_2 = arith.constant 0 : i32
    return %c0_i32, %c0_i32_0, %c0_i32_1 : i32, i32, i32
  }
  func.func @transform_5(%arg0: i32) -> (i32, i32, i32) {
    %c0_i32 = arith.constant 0 : i32
    %c0_i32_0 = arith.constant 0 : i32
    %c0_i32_1 = arith.constant 0 : i32
    %c0_i32_2 = arith.constant 0 : i32
    return %c0_i32, %c0_i32_0, %c0_i32_1 : i32, i32, i32
  }
  func.func @transform_6(%arg0: i32) -> (i32, i32, i32) {
    %c0_i32 = arith.constant 0 : i32
    %c0_i32_0 = arith.constant 0 : i32
    %c0_i32_1 = arith.constant 0 : i32
    %c0_i32_2 = arith.constant 0 : i32
    return %c0_i32, %c0_i32_0, %c0_i32_1 : i32, i32, i32
  }
  func.func @transform_7(%arg0: i32) -> (i32, i32) {
    %c0_i32 = arith.constant 0 : i32
    %c0_i32_0 = arith.constant 0 : i32
    return %arg0, %c0_i32 : i32, i32
  }
  func.func @transform_8(%arg0: i32) -> (i32, i32, i32) {
    %c0_i32 = arith.constant 0 : i32
    %c0_i32_0 = arith.constant 0 : i32
    %c0_i32_1 = arith.constant 0 : i32
    return %c0_i32, %arg0, %c0_i32_0 : i32, i32, i32
  }
}

</mosaic_0001>

<bundles_post_ra>
// kernel: tpu_custom_call.1
= control target key start
LH: loop header
LB: loop body
LE: loop exit
PB: predicated region body
PF: predicated region fallthrough
CT: control target
= control target key end

     0   :  { %14 = vsyncpa [#allocation3], 0  ;;  %s3182_s0 = inlined_call_operand.hbm [shape: f32[8,128], index: 0, kind: input, shape index: {}]   ;;  %s3183_s1 = inlined_call_operand.vmem [shape: f32[4,126,128], index: 1, kind: input, shape index: {}]   ;;  %s3184_s2 = inlined_call_operand.hbm [shape: f32[4,1,128], index: 2, kind: input, shape index: {}]   ;;  %s3185_s3 = inlined_call_operand.vmem [shape: f32[4,128,128], index: 3, kind: input, shape index: {}]   ;;  %s3186_s4 = inlined_call_operand.hbm [shape: f32[4,1,128], index: 4, kind: input, shape index: {}]   ;;  %s3187_s5 = inlined_call_operand.vmem [shape: f32[4,128,128], index: 5, kind: input, shape index: {}]   ;;  %s3188_s6 = inlined_call_operand.hbm [shape: f32[4,1,128], index: 6, kind: input, shape index: {}]   ;;  %s3189_s7 = inlined_call_operand.hbm [shape: f32[8,128], index: 7, kind: output, shape index: {0}]   ;;  %s3190_s8 = inlined_call_operand.hbm [shape: f32[4,8,128], index: 8, kind: output, shape index: {1}]  }
   0x1   :  { %15 = vsyncpa [#allocation6], 0 }
   0x2   :  { %16 = vsyncpa [#allocation9], 0 }
   0x3   :  { %17 = vsyncpa [#allocation4], 0 }
   0x4   :  { %18 = vsyncpa [#allocation12], 0  ;;  %s2261_s27 = smov [#allocation5]  }
   0x5   :  { %s36_s28 = sshll.u32 %s2261_s27, 4  ;;  %s37_s28 = int_to_ptr.vmem [resolvable:$true] %s36_s28 }
   0x6   :  { %s2139_s29 = scalar_lea.vmem %s37_s28, 64  ;;  %p2144_p1 = scmp.lt.s32.totalorder %s37_s28, %s37_s28 }
   0x7   :  { %p2140_p0 = scmp.ne.s32.totalorder %s37_s28, %s2139_s29  ;;  %p2145_p2 = scmp.lt.s32.totalorder %s2139_s29, %s2139_s29 }
   0x9   :  { %p2146_p3 = por %p2145_p2, %p2144_p1 }
   0xb   :  { %p2147_p4 = pnand %p2146_p3, %p2140_p0 }
   0xd   :  { %2150 = shalt.err (!%p2147_p4)
}
   0xe   :  { %s2262_s30 = smov 16   ;;  %s2263_s9 = smov 1  }
   0xf   :  { %42 = dma.hbm_to_vmem [thread:$0]  %s3184_s2, 64, %s37_s28, [#allocation6], %s2262_s30, %s2262_s30, %s2263_s9  }
  0x10   :  { %s2264_s12 = smov [#allocation2]   ;;  %s2265_s14 = smov [#allocation7]  }
  0x11   :  { %s25_s13 = sshll.u32 %s2264_s12, 4  ;;  %s50_s15 = sshll.u32 %s2265_s14, 4  ;;  %s26_s13 = int_to_ptr.vmem [resolvable:$true] %s25_s13  ;;  %s51_s15 = int_to_ptr.vmem [resolvable:$true] %s50_s15 }
  0x12   :  { %s2159_s16 = scalar_lea.vmem %s26_s13, 128  ;;  %p2164_p6 = scmp.lt.s32.totalorder %s26_s13, %s26_s13 }
  0x13   :  { %p2160_p5 = scmp.ne.s32.totalorder %s26_s13, %s2159_s16  ;;  %p2165_p7 = scmp.lt.s32.totalorder %s2159_s16, %s2159_s16 }
  0x15   :  { %p2166_p8 = por %p2165_p7, %p2164_p6 }
  0x17   :  { %p2167_p9 = pnand %p2166_p8, %p2160_p5 }
  0x19   :  { %2170 = shalt.err (!%p2167_p9)
}
  0x1a   :  { %28 = dma.hbm_to_vmem [thread:$0]  %s3182_s0, 128, %s26_s13, [#allocation3]  }
  0x1b   :  { %s2179_s19 = scalar_lea.vmem %s51_s15, 64  ;;  %p2184_p11 = scmp.lt.s32.totalorder %s51_s15, %s51_s15 }
  0x1c   :  { %p2180_p10 = scmp.ne.s32.totalorder %s51_s15, %s2179_s19  ;;  %p2185_p12 = scmp.lt.s32.totalorder %s2179_s19, %s2179_s19 }
  0x1e   :  { %p2186_p13 = por %p2185_p12, %p2184_p11 }
  0x20   :  { %p2187_p0 = pnand %p2186_p13, %p2180_p10 }
  0x22   :  { %2190 = shalt.err (!%p2187_p0)
}
  0x23   :  { %56 = dma.hbm_to_vmem [thread:$0]  %s3186_s4, 64, %s51_s15, [#allocation6], %s2262_s30, %s2262_s30, %s2263_s9  }
  0x24   :  { %s2266_s21 = smov [#allocation8]  }
  0x25   :  { %s64_s22 = sshll.u32 %s2266_s21, 4  ;;  %s65_s22 = int_to_ptr.vmem [resolvable:$true] %s64_s22 }
  0x26   :  { %s2199_s23 = scalar_lea.vmem %s65_s22, 64  ;;  %p2204_p2 = scmp.lt.s32.totalorder %s65_s22, %s65_s22 }
  0x27   :  { %p2200_p1 = scmp.ne.s32.totalorder %s65_s22, %s2199_s23  ;;  %p2205_p3 = scmp.lt.s32.totalorder %s2199_s23, %s2199_s23 }
  0x29   :  { %p2206_p4 = por %p2205_p3, %p2204_p2 }
  0x2b   :  { %p2207_p5 = pnand %p2206_p4, %p2200_p1 }
  0x2d   :  { %2210 = shalt.err (!%p2207_p5)
}
  0x2e   :  { %70 = dma.hbm_to_vmem [thread:$0]  %s3188_s6, 64, %s65_s22, [#allocation9], %s2262_s30, %s2262_s30, %s2263_s9  }
  0x2f   :  { %2251 = dma.done.wait [#allocation3], 128  }
  0x30   :  { %2252 = vsyncadd [#allocation3], 4294967168 }
  0x31   :  { %2253 = dma.done.wait [#allocation6], 128  }
  0x32   :  { %2254 = vsyncadd [#allocation6], 4294967168 }
  0x33   :  { %2255 = dma.done.wait [#allocation9], 64  }
  0x34   :  { %2256 = vsyncadd [#allocation9], 4294967232  ;;  %v2267_v0 = vmov 0.0   ;;  %vm2268_vm0 = vmmov 0   ;;  %vm116_vm1 = vcmask 1045504   ;;  %v2347_v1 = vld [vmem:[#allocation2] sm:$0xff] }
  0x35   :  { %1697 = vmatprep.subr.mxu0 %v2267_v0  ;;  %1729 = vmatprep.mubr.msk.f32.mxu0 %vm2268_vm0, %v2267_v0  ;;  %v104_v2 = vld [vmem:[%s3183_s1 + $0x78] sm:$0x3f]  ;;  %v103_v3 = vld [vmem:[%s3183_s1 + $0x70] sm:$0xff]  ;;  %s2269_s27 = smov 127   ;;  %v102_v4 = vld [vmem:[%s3183_s1 + $0x68] sm:$0xff]  ;;  %vm112_vm2 = vcmask 1031168  }
  0x36   :  { %1732 = vmatprep.subr.mxu1 %v2267_v0  ;;  %1764 = vmatprep.mubr.msk.f32.mxu1 %vm2268_vm0, %v2267_v0  ;;  %v101_v5 = vld [vmem:[%s3183_s1 + $0x60] sm:$0xff]  ;;  %v206_v6 = vld [vmem:[%s3185_s3 + $0x78] sm:$0xff]  ;;  %v205_v8 = vld [vmem:[%s3185_s3 + $0x70] sm:$0xff]  ;;  %s2270_s15 = smov 126   ;;  %s2271_s9 = smov [#allocation11]  }
  0x37   :  { %85 = vrot.lane.b32.xlu0 %v2347_v1, %s2269_s27  ;;  %1698 = vmatpush3.msk.msra.mxu0 %vm116_vm1, %v104_v2  ;;  %v100_v7 = vld [vmem:[%s3183_s1 + $0x58] sm:$0xff]  ;;  %v204_v9 = vld [vmem:[%s3185_s3 + $0x68] sm:$0xff]  ;;  %v99_v10 = vld [vmem:[%s3183_s1 + $0x50] sm:$0xff]  ;;  %s1311_s10 = sshll.u32 %s2271_s9, 4  ;;  %s1312_s10 = int_to_ptr.vmem [resolvable:$true] %s1311_s10 }
  0x38   :  { %1699 = vmatprep.subr.mxu0 %v2267_v0  ;;  %1733 = vmatpush3.msra.mxu1 %v206_v6  ;;  %v203_v11 = vld [vmem:[%s3185_s3 + $0x60] sm:$0xff]  ;;  %v98_v12 = vld [vmem:[%s3183_s1 + $0x48] sm:$0xff]  ;;  %v202_v13 = vld [vmem:[%s3185_s3 + $0x58] sm:$0xff]  ;;  %p2216_p7 = scmp.lt.s32.totalorder %s1312_s10, %s1312_s10 }
  0x39   :  { %1700 = vmatpush3.msra.mxu0 %v103_v3  ;;  %1734 = vmatprep.subr.mxu1 %v2267_v0  ;;  %v97_v14 = vld [vmem:[%s3183_s1 + $0x40] sm:$0xff]  ;;  %v201_v15 = vld [vmem:[%s3185_s3 + $0x50] sm:$0xff]  ;;  %v96_v16 = vld [vmem:[%s3183_s1 + $0x38] sm:$0xff] }
  0x3a   :  { %1701 = vmatprep.subr.mxu0 %v2267_v0  ;;  %1735 = vmatpush3.msra.mxu1 %v205_v8  ;;  %v200_v17 = vld [vmem:[%s3185_s3 + $0x48] sm:$0xff]  ;;  %v95_v18 = vld [vmem:[%s3183_s1 + $0x30] sm:$0xff]  ;;  %v199_v19 = vld [vmem:[%s3185_s3 + $0x40] sm:$0xff] }
  0x3b   :  { %1702 = vmatpush3.msra.mxu0 %v102_v4  ;;  %1736 = vmatprep.subr.mxu1 %v2267_v0  ;;  %v94_v20 = vld [vmem:[%s3183_s1 + $0x28] sm:$0xff]  ;;  %v198_v21 = vld [vmem:[%s3185_s3 + $0x38] sm:$0xff]  ;;  %v93_v22 = vld [vmem:[%s3183_s1 + $0x20] sm:$0xff] }
  0x3c   :  { %1703 = vmatprep.subr.mxu0 %v2267_v0  ;;  %1737 = vmatpush3.msra.mxu1 %v204_v9  ;;  %v197_v23 = vld [vmem:[%s3185_s3 + $0x30] sm:$0xff]  ;;  %v92_v24 = vld [vmem:[%s3183_s1 + $0x18] sm:$0xff]  ;;  %v196_v25 = vld [vmem:[%s3185_s3 + $0x28] sm:$0xff] }
  0x3d   :  { %1704 = vmatpush3.msra.mxu0 %v101_v5  ;;  %1738 = vmatprep.subr.mxu1 %v2267_v0  ;;  %v91_v26 = vld [vmem:[%s3183_s1 + $0x10] sm:$0xff]  ;;  %v195_v27 = vld [vmem:[%s3185_s3 + $0x20] sm:$0xff]  ;;  %v90_v28 = vld [vmem:[%s3183_s1 + $0x8] sm:$0xff] }
  0x3e   :  { %1705 = vmatprep.subr.mxu0 %v2267_v0  ;;  %1739 = vmatpush3.msra.mxu1 %v203_v11  ;;  %v194_v29 = vld [vmem:[%s3185_s3 + $0x18] sm:$0xff]  ;;  %v89_v30 = vld [vmem:[%s3183_s1] sm:$0xff]  ;;  %v193_v33 = vld [vmem:[%s3185_s3 + $0x10] sm:$0xff] }
  0x3f   :  { %1706 = vmatpush3.msra.mxu0 %v100_v7  ;;  %1740 = vmatprep.subr.mxu1 %v2267_v0  ;;  %v192_v34 = vld [vmem:[%s3185_s3 + $0x8] sm:$0xff]  ;;  %v191_v35 = vld [vmem:[%s3185_s3] sm:$0xff]  ;;  %v300_v36 = vld [vmem:[%s3187_s5 + $0x78] sm:$0xff] }
  0x40   :  { %1707 = vmatprep.subr.mxu0 %v2267_v0  ;;  %1741 = vmatpush3.msra.mxu1 %v202_v13  ;;  %v299_v37 = vld [vmem:[%s3187_s5 + $0x70] sm:$0xff]  ;;  %v298_v38 = vld [vmem:[%s3187_s5 + $0x68] sm:$0xff]  ;;  %v297_v39 = vld [vmem:[%s3187_s5 + $0x60] sm:$0xff] }
  0x41   :  { %1708 = vmatpush3.msra.mxu0 %v99_v10  ;;  %1742 = vmatprep.subr.mxu1 %v2267_v0  ;;  %v296_v40 = vld [vmem:[%s3187_s5 + $0x58] sm:$0xff]  ;;  %v295_v41 = vld [vmem:[%s3187_s5 + $0x50] sm:$0xff]  ;;  %v294_v42 = vld [vmem:[%s3187_s5 + $0x48] sm:$0xff] }
  0x42   :  { %1709 = vmatprep.subr.mxu0 %v2267_v0  ;;  %1743 = vmatpush3.msra.mxu1 %v201_v15  ;;  %v293_v43 = vld [vmem:[%s3187_s5 + $0x40] sm:$0xff]  ;;  %v292_v44 = vld [vmem:[%s3187_s5 + $0x38] sm:$0xff]  ;;  %v291_v45 = vld [vmem:[%s3187_s5 + $0x30] sm:$0xff] }
  0x43   :  { %1710 = vmatpush3.msra.mxu0 %v98_v12  ;;  %1744 = vmatprep.subr.mxu1 %v2267_v0  ;;  %v290_v46 = vld [vmem:[%s3187_s5 + $0x28] sm:$0xff]  ;;  %v289_v47 = vld [vmem:[%s3187_s5 + $0x20] sm:$0xff]  ;;  %v288_v48 = vld [vmem:[%s3187_s5 + $0x18] sm:$0xff] }
  0x44   :  { %1711 = vmatprep.subr.mxu0 %v2267_v0  ;;  %1745 = vmatpush3.msra.mxu1 %v200_v17  ;;  %v1329_v49 = vld [vmem:[#allocation5] ss:$0 sm:$0xff]  ;;  %v287_v54 = vld [vmem:[%s3187_s5 + $0x10] sm:$0xff]  ;;  %v285_v56 = vld [vmem:[%s3187_s5] sm:$0xff] }
  0x45   :  { %1712 = vmatpush3.msra.mxu0 %v97_v14  ;;  %1746 = vmatprep.subr.mxu1 %v2267_v0  ;;  %v286_v55 = vld [vmem:[%s3187_s5 + $0x8] sm:$0xff]  ;;  %v1349_v62 = vld [vmem:[%s3183_s1 + $0xf8] sm:$0x3f]  ;;  %v1348_v63 = vld [vmem:[%s3183_s1 + $0xf0] sm:$0xff] }
  0x46   :  { %1713 = vmatprep.subr.mxu0 %v2267_v0  ;;  %1747 = vmatpush3.msra.mxu1 %v199_v19  ;;  %v1332_v57 = vld [vmem:[#allocation7] ss:$0 sm:$0xff]  ;;  %v1346_v3 = vld [vmem:[%s3183_s1 + $0xe0] sm:$0xff]  ;;  %v1345_v4 = vld [vmem:[%s3183_s1 + $0xd8] sm:$0xff] }
  0x47   :  { %1714 = vmatpush3.msra.mxu0 %v96_v16  ;;  %1748 = vmatprep.subr.mxu1 %v2267_v0  ;;  %v1347_v2 = vld [vmem:[%s3183_s1 + $0xe8] sm:$0xff]  ;;  %v1344_v5 = vld [vmem:[%s3183_s1 + $0xd0] sm:$0xff]  ;;  %v1342_v7 = vld [vmem:[%s3183_s1 + $0xc0] sm:$0xff] }
  0x48   :  { %1715 = vmatprep.subr.mxu0 %v2267_v0  ;;  %1749 = vmatpush3.msra.mxu1 %v198_v21  ;;  %v1343_v6 = vld [vmem:[%s3183_s1 + $0xc8] sm:$0xff]  ;;  %v1341_v8 = vld [vmem:[%s3183_s1 + $0xb8] sm:$0xff]  ;;  %v1340_v9 = vld [vmem:[%s3183_s1 + $0xb0] sm:$0xff] }
  0x49   :  { %1716 = vmatpush3.msra.mxu0 %v95_v18  ;;  %1750 = vmatprep.subr.mxu1 %v2267_v0  ;;  %v1339_v10 = vld [vmem:[%s3183_s1 + $0xa8] sm:$0xff]  ;;  %v1338_v11 = vld [vmem:[%s3183_s1 + $0xa0] sm:$0xff]  ;;  %v1337_v12 = vld [vmem:[%s3183_s1 + $0x98] sm:$0xff] }
  0x4a   :  { %1717 = vmatprep.subr.mxu0 %v2267_v0  ;;  %1751 = vmatpush3.msra.mxu1 %v197_v23  ;;  %v1336_v13 = vld [vmem:[%s3183_s1 + $0x90] sm:$0xff]  ;;  %v1335_v14 = vld [vmem:[%s3183_s1 + $0x88] sm:$0xff]  ;;  %v1334_v15 = vld [vmem:[%s3183_s1 + $0x80] sm:$0xff] }
  0x4b   :  { %1718 = vmatpush3.msra.mxu0 %v94_v20  ;;  %1752 = vmatprep.subr.mxu1 %v2267_v0  ;;  %v1368_v16 = vld [vmem:[%s3185_s3 + $0xf8] sm:$0xff]  ;;  %v1367_v17 = vld [vmem:[%s3185_s3 + $0xf0] sm:$0xff]  ;;  %v1366_v18 = vld [vmem:[%s3185_s3 + $0xe8] sm:$0xff] }
  0x4c   :  { %1719 = vmatprep.subr.mxu0 %v2267_v0  ;;  %1753 = vmatpush3.msra.mxu1 %v196_v25  ;;  %v1333_v19 = vld [vmem:[#allocation8] ss:$0 sm:$0xff]  ;;  %v1365_v20 = vld [vmem:[%s3185_s3 + $0xe0] sm:$0xff] }
  0x4d   :  { %1720 = vmatpush3.msra.mxu0 %v93_v22  ;;  %1754 = vmatprep.subr.mxu1 %v2267_v0  ;;  %v1364_v22 = vld [vmem:[%s3185_s3 + $0xd8] sm:$0xff]  ;;  %v1363_v25 = vld [vmem:[%s3185_s3 + $0xd0] sm:$0xff] }
  0x4e   :  { %1721 = vmatprep.subr.mxu0 %v2267_v0  ;;  %1755 = vmatpush3.msra.mxu1 %v195_v27  ;;  %v1362_v27 = vld [vmem:[%s3185_s3 + $0xc8] sm:$0xff] }
  0x4f   :  { %1722 = vmatpush3.msra.mxu0 %v92_v24  ;;  %1756 = vmatprep.subr.mxu1 %v2267_v0 }
  0x50   :  { %1723 = vmatprep.subr.mxu0 %v2267_v0  ;;  %1757 = vmatpush3.msra.mxu1 %v194_v29  ;;  %v1359_v29 = vld [vmem:[%s3185_s3 + $0xb0] sm:$0xff] }
  0x51   :  { %1724 = vmatpush3.msra.mxu0 %v91_v26  ;;  %1758 = vmatprep.subr.mxu1 %v2267_v0 }
  0x52   :  { %1725 = vmatprep.subr.mxu0 %v2267_v0  ;;  %1759 = vmatpush3.msra.mxu1 %v193_v33 }
  0x53   :  { %1726 = vmatpush3.msra.mxu0 %v90_v28  ;;  %1760 = vmatprep.subr.mxu1 %v2267_v0  ;;  %v1361_v28 = vld [vmem:[%s3185_s3 + $0xc0] sm:$0xff] }
  0x54   :  { %1727 = vmatprep.subr.mxu0 %v2267_v0  ;;  %1761 = vmatpush3.msra.mxu1 %v192_v34 }
  0x55   :  { %1728 = vmatpush3.msra.mxu0 %v89_v30  ;;  %1762 = vmatprep.subr.mxu1 %v2267_v0  ;;  %v1358_v30 = vld [vmem:[%s3185_s3 + $0xa8] sm:$0xff] }
  0x56   :  { %1767 = vmatprep.subr.mxu0 %v2267_v0  ;;  %1763 = vmatpush3.msra.mxu1 %v191_v35  ;;  %v1355_v35 = vld [vmem:[%s3185_s3 + $0x90] sm:$0xff] }
  0x57   :  { %1802 = vmatprep.subr.mxu1 %v2267_v0 }
  0xa9   :  { %v86_v31 = vpop.permute.xlu0 %85 }
  0xaa   :  { %v88_v32 = vmax.f32 %v2347_v1, %v86_v31  ;;  %v1357_v31 = vld [vmem:[%s3185_s3 + $0xa0] sm:$0xff] }
  0xac   :  { %1730 = vmatmul.mubr.msk.f32.vlgmr.msra.gmra.mxu0 %vm112_vm2, %v88_v32  ;;  %v1356_v32 = vld [vmem:[%s3185_s3 + $0x98] sm:$0xff] }
  0xad   :  { %1799 = vmatprep.mubr.msk.f32.mxu0 %vm2268_vm0, %v2267_v0  ;;  %1768 = vmatpush3.msra.mxu0 %v300_v36  ;;  %v1354_v36 = vld [vmem:[%s3185_s3 + $0x88] sm:$0xff] }
  0xae   :  { %1769 = vmatprep.subr.mxu0 %v2267_v0 }
  0xaf   :  { %1770 = vmatpush3.msra.mxu0 %v299_v37  ;;  %v1353_v37 = vld [vmem:[%s3185_s3 + $0x80] sm:$0xff] }
  0xb0   :  { %1771 = vmatprep.subr.mxu0 %v2267_v0 }
  0xb1   :  { %1772 = vmatpush3.msra.mxu0 %v298_v38  ;;  %v1385_v38 = vld [vmem:[%s3187_s5 + $0xf8] sm:$0xff] }
  0xb2   :  { %1773 = vmatprep.subr.mxu0 %v2267_v0 }
  0xb3   :  { %1774 = vmatpush3.msra.mxu0 %v297_v39  ;;  %v1384_v39 = vld [vmem:[%s3187_s5 + $0xf0] sm:$0xff] }
  0xb4   :  { %1775 = vmatprep.subr.mxu0 %v2267_v0 }
  0xb5   :  { %1776 = vmatpush3.msra.mxu0 %v296_v40  ;;  %v1383_v40 = vld [vmem:[%s3187_s5 + $0xe8] sm:$0xff] }
  0xb6   :  { %1777 = vmatprep.subr.mxu0 %v2267_v0 }
  0xb7   :  { %1778 = vmatpush3.msra.mxu0 %v295_v41  ;;  %v1382_v41 = vld [vmem:[%s3187_s5 + $0xe0] sm:$0xff] }
  0xb8   :  { %1779 = vmatprep.subr.mxu0 %v2267_v0 }
  0xb9   :  { %1780 = vmatpush3.msra.mxu0 %v294_v42  ;;  %v1381_v42 = vld [vmem:[%s3187_s5 + $0xd8] sm:$0xff] }
  0xba   :  { %1781 = vmatprep.subr.mxu0 %v2267_v0 }
  0xbb   :  { %1782 = vmatpush3.msra.mxu0 %v293_v43  ;;  %v1380_v43 = vld [vmem:[%s3187_s5 + $0xd0] sm:$0xff] }
  0xbc   :  { %1783 = vmatprep.subr.mxu0 %v2267_v0 }
  0xbd   :  { %1784 = vmatpush3.msra.mxu0 %v292_v44  ;;  %v1379_v44 = vld [vmem:[%s3187_s5 + $0xc8] sm:$0xff] }
  0xbe   :  { %1785 = vmatprep.subr.mxu0 %v2267_v0 }
  0xbf   :  { %1786 = vmatpush3.msra.mxu0 %v291_v45  ;;  %v1378_v45 = vld [vmem:[%s3187_s5 + $0xc0] sm:$0xff] }
  0xc0   :  { %1787 = vmatprep.subr.mxu0 %v2267_v0 }
  0xc1   :  { %1788 = vmatpush3.msra.mxu0 %v290_v46  ;;  %v1377_v46 = vld [vmem:[%s3187_s5 + $0xb8] sm:$0xff] }
  0xc2   :  { %1789 = vmatprep.subr.mxu0 %v2267_v0 }
  0xc3   :  { %1790 = vmatpush3.msra.mxu0 %v289_v47  ;;  %v1376_v47 = vld [vmem:[%s3187_s5 + $0xb0] sm:$0xff] }
  0xc4   :  { %1791 = vmatprep.subr.mxu0 %v2267_v0 }
  0xc5   :  { %1792 = vmatpush3.msra.mxu0 %v288_v48  ;;  %v1375_v48 = vld [vmem:[%s3187_s5 + $0xa8] sm:$0xff] }
  0xc6   :  { %1793 = vmatprep.subr.mxu0 %v2267_v0 }
  0xc7   :  { %1794 = vmatpush3.msra.mxu0 %v287_v54 }
  0xc8   :  { %1795 = vmatprep.subr.mxu0 %v2267_v0 }
  0xc9   :  { %1796 = vmatpush3.msra.mxu0 %v286_v55 }
  0xca   :  { %1797 = vmatprep.subr.mxu0 %v2267_v0 }
  0xcb   :  { %1798 = vmatpush3.msra.mxu0 %v285_v56  ;;  %v1372_v56 = vld [vmem:[%s3187_s5 + $0x90] sm:$0xff] }
  0xcc   :  { %1837 = vmatprep.subr.mxu0 %v2267_v0 }
 0x16c   :  { %v186_v50 = vpop.f32.mrf.mxu0 }
 0x16d   :  { %v187_v51 = vadd.f32 %v1329_v49, %v186_v50  ;;  %v1374_v49 = vld [vmem:[%s3187_s5 + $0xa0] sm:$0xff]  ;;  %v1373_v50 = vld [vmem:[%s3187_s5 + $0x98] sm:$0xff] }
 0x16e   :  { %v1731_v52 = vpop.f32.mrf.mxu0 }
 0x16f   :  { %v190_v53 = vmax.f32 %v187_v51, 0.0  ;;  %v1350_v51 = vld [vmem:[#allocation5 + $0x1] ss:$0 sm:$0xff] }
 0x171   :  { %1765 = vmatmul.mubr.f32.vlgmr.msra.gmra.mxu1 %v190_v53 }
 0x172   :  { %1834 = vmatprep.mubr.msk.f32.mxu1 %vm2268_vm0, %v2267_v0  ;;  %1803 = vmatpush3.msk.msra.mxu1 %vm116_vm1, %v1349_v62 }
 0x173   :  { %1804 = vmatprep.subr.mxu1 %v2267_v0 }
 0x174   :  { %1805 = vmatpush3.msra.mxu1 %v1348_v63 }
 0x175   :  { %1806 = vmatprep.subr.mxu1 %v2267_v0 }
 0x176   :  { %1807 = vmatpush3.msra.mxu1 %v1347_v2  ;;  %v1402_v2 = vld [vmem:[%s3183_s1 + $0x178] sm:$0x3f] }
 0x177   :  { %1808 = vmatprep.subr.mxu1 %v2267_v0 }
 0x178   :  { %1809 = vmatpush3.msra.mxu1 %v1346_v3  ;;  %v1401_v3 = vld [vmem:[%s3183_s1 + $0x170] sm:$0xff] }
 0x179   :  { %1810 = vmatprep.subr.mxu1 %v2267_v0 }
 0x17a   :  { %1811 = vmatpush3.msra.mxu1 %v1345_v4  ;;  %v1400_v4 = vld [vmem:[%s3183_s1 + $0x168] sm:$0xff] }
 0x17b   :  { %1812 = vmatprep.subr.mxu1 %v2267_v0 }
 0x17c   :  { %1813 = vmatpush3.msra.mxu1 %v1344_v5  ;;  %v1399_v5 = vld [vmem:[%s3183_s1 + $0x160] sm:$0xff] }
 0x17d   :  { %1814 = vmatprep.subr.mxu1 %v2267_v0 }
 0x17e   :  { %1815 = vmatpush3.msra.mxu1 %v1343_v6  ;;  %v1398_v6 = vld [vmem:[%s3183_s1 + $0x158] sm:$0xff] }
 0x17f   :  { %1816 = vmatprep.subr.mxu1 %v2267_v0 }
 0x180   :  { %1817 = vmatpush3.msra.mxu1 %v1342_v7  ;;  %v1397_v7 = vld [vmem:[%s3183_s1 + $0x150] sm:$0xff] }
 0x181   :  { %1818 = vmatprep.subr.mxu1 %v2267_v0 }
 0x182   :  { %1819 = vmatpush3.msra.mxu1 %v1341_v8  ;;  %v1396_v8 = vld [vmem:[%s3183_s1 + $0x148] sm:$0xff] }
 0x183   :  { %1820 = vmatprep.subr.mxu1 %v2267_v0 }
 0x184   :  { %1821 = vmatpush3.msra.mxu1 %v1340_v9  ;;  %v1395_v9 = vld [vmem:[%s3183_s1 + $0x140] sm:$0xff] }
 0x185   :  { %1822 = vmatprep.subr.mxu1 %v2267_v0 }
 0x186   :  { %1823 = vmatpush3.msra.mxu1 %v1339_v10  ;;  %v1394_v10 = vld [vmem:[%s3183_s1 + $0x138] sm:$0xff] }
 0x187   :  { %1824 = vmatprep.subr.mxu1 %v2267_v0 }
 0x188   :  { %1825 = vmatpush3.msra.mxu1 %v1338_v11  ;;  %v1393_v11 = vld [vmem:[%s3183_s1 + $0x130] sm:$0xff] }
 0x189   :  { %1826 = vmatprep.subr.mxu1 %v2267_v0 }
 0x18a   :  { %1827 = vmatpush3.msra.mxu1 %v1337_v12  ;;  %v1392_v12 = vld [vmem:[%s3183_s1 + $0x128] sm:$0xff] }
 0x18b   :  { %1828 = vmatprep.subr.mxu1 %v2267_v0 }
 0x18c   :  { %1829 = vmatpush3.msra.mxu1 %v1336_v13  ;;  %v1391_v13 = vld [vmem:[%s3183_s1 + $0x120] sm:$0xff] }
 0x18d   :  { %1830 = vmatprep.subr.mxu1 %v2267_v0 }
 0x18e   :  { %1831 = vmatpush3.msra.mxu1 %v1335_v14  ;;  %v1390_v14 = vld [vmem:[%s3183_s1 + $0x118] sm:$0xff] }
 0x18f   :  { %1832 = vmatprep.subr.mxu1 %v2267_v0 }
 0x190   :  { %1833 = vmatpush3.msra.mxu1 %v1334_v15  ;;  %v1389_v15 = vld [vmem:[%s3183_s1 + $0x110] sm:$0xff] }
 0x191   :  { %1872 = vmatprep.subr.mxu1 %v2267_v0 }
 0x231   :  { %v280_v58 = vpop.f32.mrf.mxu1 }
 0x232   :  { %v281_v59 = vadd.f32 %v1332_v57, %v280_v58  ;;  %v1371_v57 = vld [vmem:[%s3187_s5 + $0x88] sm:$0xff]  ;;  %v1370_v58 = vld [vmem:[%s3187_s5 + $0x80] sm:$0xff] }
 0x233   :  { %v1766_v60 = vpop.f32.mrf.mxu1 }
 0x234   :  { %v284_v61 = vmax.f32 %v281_v59, 0.0  ;;  %v1369_v59 = vld [vmem:[#allocation7 + $0x1] ss:$0 sm:$0xff] }
 0x236   :  { %1800 = vmatmul.mubr.f32.vlgmr.msra.gmra.mxu0 %v284_v61 }
 0x237   :  { %1869 = vmatprep.mubr.msk.f32.mxu0 %vm2268_vm0, %v2267_v0  ;;  %1838 = vmatpush3.msra.mxu0 %v1368_v16  ;;  %v1388_v16 = vld [vmem:[%s3183_s1 + $0x108] sm:$0xff] }
 0x238   :  { %1839 = vmatprep.subr.mxu0 %v2267_v0 }
 0x239   :  { %1840 = vmatpush3.msra.mxu0 %v1367_v17  ;;  %v1387_v17 = vld [vmem:[%s3183_s1 + $0x100] sm:$0xff] }
 0x23a   :  { %1841 = vmatprep.subr.mxu0 %v2267_v0 }
 0x23b   :  { %1842 = vmatpush3.msra.mxu0 %v1366_v18  ;;  %v1386_v18 = vld [vmem:[#allocation8 + $0x1] ss:$0 sm:$0xff] }
 0x23c   :  { %1843 = vmatprep.subr.mxu0 %v2267_v0 }
 0x23d   :  { %1844 = vmatpush3.msra.mxu0 %v1365_v20  ;;  %v1420_v20 = vld [vmem:[%s3185_s3 + $0x170] sm:$0xff] }
 0x23e   :  { %1845 = vmatprep.subr.mxu0 %v2267_v0 }
 0x23f   :  { %1846 = vmatpush3.msra.mxu0 %v1364_v22  ;;  %v1419_v22 = vld [vmem:[%s3185_s3 + $0x168] sm:$0xff] }
 0x240   :  { %1847 = vmatprep.subr.mxu0 %v2267_v0 }
 0x241   :  { %1848 = vmatpush3.msra.mxu0 %v1363_v25 }
 0x242   :  { %1849 = vmatprep.subr.mxu0 %v2267_v0 }
 0x243   :  { %1850 = vmatpush3.msra.mxu0 %v1362_v27  ;;  %v1418_v27 = vld [vmem:[%s3185_s3 + $0x160] sm:$0xff] }
 0x244   :  { %1851 = vmatprep.subr.mxu0 %v2267_v0 }
 0x245   :  { %1852 = vmatpush3.msra.mxu0 %v1361_v28 }
 0x246   :  { %1853 = vmatprep.subr.mxu0 %v2267_v0 }
 0x2f6   :  { %v374_v21 = vpop.f32.mrf.mxu0 }
 0x2f7   :  { %v2635_v23 = vadd.f32 %v1333_v19, %v374_v21  ;;  %v1421_v19 = vld [vmem:[%s3185_s3 + $0x178] sm:$0xff] }
 0x2f8   :  { %v1801_v24 = vpop.f32.mrf.mxu0 }
 0x2f9   :  { %378 = vst [vmem:[#allocation11] sm:$0xff] %v2635_v23  ;;  %v2644_v26 = vsub.f32 %v2347_v1, %v2635_v23  ;;  %v1360_v1 = vld [vmem:[%s3185_s3 + $0xb8] sm:$0xff] }
 0x2fa   :  { %1854 = vmatpush3.msra.mxu0 %v1360_v1  ;;  %v1417_v1 = vld [vmem:[%s3185_s3 + $0x158] sm:$0xff] }
 0x2fb   :  { %382 = vrot.lane.b32.xlu0 %v2644_v26, %s2269_s27  ;;  %1855 = vmatprep.subr.mxu0 %v2267_v0 }
 0x2fc   :  { %1856 = vmatpush3.msra.mxu0 %v1359_v29  ;;  %v1416_v29 = vld [vmem:[%s3185_s3 + $0x150] sm:$0xff] }
 0x2fd   :  { %1857 = vmatprep.subr.mxu0 %v2267_v0 }
 0x2fe   :  { %1858 = vmatpush3.msra.mxu0 %v1358_v30  ;;  %v1414_v30 = vld [vmem:[%s3185_s3 + $0x140] sm:$0xff] }
 0x2ff   :  { %1859 = vmatprep.subr.mxu0 %v2267_v0 }
 0x300   :  { %1860 = vmatpush3.msra.mxu0 %v1357_v31  ;;  %v1413_v31 = vld [vmem:[%s3185_s3 + $0x138] sm:$0xff] }
 0x301   :  { %1861 = vmatprep.subr.mxu0 %v2267_v0 }
 0x302   :  { %1862 = vmatpush3.msra.mxu0 %v1356_v32  ;;  %v1412_v32 = vld [vmem:[%s3185_s3 + $0x130] sm:$0xff] }
 0x303   :  { %1863 = vmatprep.subr.mxu0 %v2267_v0 }
 0x304   :  { %1864 = vmatpush3.msra.mxu0 %v1355_v35  ;;  %v1409_v35 = vld [vmem:[%s3185_s3 + $0x118] sm:$0xff] }
 0x305   :  { %1865 = vmatprep.subr.mxu0 %v2267_v0 }
 0x306   :  { %1866 = vmatpush3.msra.mxu0 %v1354_v36 }
 0x307   :  { %1867 = vmatprep.subr.mxu0 %v2267_v0 }
 0x308   :  { %1868 = vmatpush3.msra.mxu0 %v1353_v37 }
 0x309   :  { %1907 = vmatprep.subr.mxu0 %v2267_v0 }
 0x36d   :  { %v383_v33 = vpop.permute.xlu0 %382 }
 0x36e   :  { %v385_v34 = vmax.f32 %v2644_v26, %v383_v33  ;;  %v1411_v33 = vld [vmem:[%s3185_s3 + $0x128] sm:$0xff] }
 0x370   :  { %1835 = vmatmul.mubr.msk.f32.vlgmr.msra.gmra.mxu1 %vm112_vm2, %v385_v34  ;;  %v1410_v34 = vld [vmem:[%s3185_s3 + $0x120] sm:$0xff] }
 0x371   :  { %1904 = vmatprep.mubr.msk.f32.mxu1 %vm2268_vm0, %v2267_v0  ;;  %1873 = vmatpush3.msra.mxu1 %v1385_v38 }
 0x372   :  { %1874 = vmatprep.subr.mxu1 %v2267_v0 }
 0x373   :  { %1875 = vmatpush3.msra.mxu1 %v1384_v39 }
 0x374   :  { %1876 = vmatprep.subr.mxu1 %v2267_v0 }
 0x375   :  { %1877 = vmatpush3.msra.mxu1 %v1383_v40  ;;  %v1408_v40 = vld [vmem:[%s3185_s3 + $0x110] sm:$0xff] }
 0x376   :  { %1878 = vmatprep.subr.mxu1 %v2267_v0 }
 0x377   :  { %1879 = vmatpush3.msra.mxu1 %v1382_v41  ;;  %v1407_v41 = vld [vmem:[%s3185_s3 + $0x108] sm:$0xff] }
 0x378   :  { %1880 = vmatprep.subr.mxu1 %v2267_v0 }
 0x379   :  { %1881 = vmatpush3.msra.mxu1 %v1381_v42  ;;  %v1406_v42 = vld [vmem:[%s3185_s3 + $0x100] sm:$0xff] }
 0x37a   :  { %1882 = vmatprep.subr.mxu1 %v2267_v0 }
 0x37b   :  { %1883 = vmatpush3.msra.mxu1 %v1380_v43  ;;  %v1438_v43 = vld [vmem:[%s3187_s5 + $0x178] sm:$0xff] }
 0x37c   :  { %1884 = vmatprep.subr.mxu1 %v2267_v0 }
 0x37d   :  { %1885 = vmatpush3.msra.mxu1 %v1379_v44  ;;  %v1437_v44 = vld [vmem:[%s3187_s5 + $0x170] sm:$0xff] }
 0x37e   :  { %1886 = vmatprep.subr.mxu1 %v2267_v0 }
 0x37f   :  { %1887 = vmatpush3.msra.mxu1 %v1378_v45  ;;  %v1436_v45 = vld [vmem:[%s3187_s5 + $0x168] sm:$0xff] }
 0x380   :  { %1888 = vmatprep.subr.mxu1 %v2267_v0 }
 0x381   :  { %1889 = vmatpush3.msra.mxu1 %v1377_v46  ;;  %v1435_v46 = vld [vmem:[%s3187_s5 + $0x160] sm:$0xff] }
 0x382   :  { %1890 = vmatprep.subr.mxu1 %v2267_v0 }
 0x383   :  { %1891 = vmatpush3.msra.mxu1 %v1376_v47  ;;  %v1434_v47 = vld [vmem:[%s3187_s5 + $0x158] sm:$0xff] }
 0x384   :  { %1892 = vmatprep.subr.mxu1 %v2267_v0 }
 0x385   :  { %1893 = vmatpush3.msra.mxu1 %v1375_v48  ;;  %v1433_v48 = vld [vmem:[%s3187_s5 + $0x150] sm:$0xff] }
 0x386   :  { %1894 = vmatprep.subr.mxu1 %v2267_v0 }
 0x387   :  { %1895 = vmatpush3.msra.mxu1 %v1374_v49  ;;  %v1432_v49 = vld [vmem:[%s3187_s5 + $0x148] sm:$0xff] }
 0x388   :  { %1896 = vmatprep.subr.mxu1 %v2267_v0 }
 0x389   :  { %1897 = vmatpush3.msra.mxu1 %v1373_v50  ;;  %v1431_v50 = vld [vmem:[%s3187_s5 + $0x140] sm:$0xff] }
 0x38a   :  { %1898 = vmatprep.subr.mxu1 %v2267_v0 }
 0x38b   :  { %1899 = vmatpush3.msra.mxu1 %v1372_v56  ;;  %v1403_v56 = vld [vmem:[#allocation5 + $0x2] ss:$0 sm:$0xff] }
 0x38c   :  { %1900 = vmatprep.subr.mxu1 %v2267_v0 }
 0x38d   :  { %1901 = vmatpush3.msra.mxu1 %v1371_v57 }
 0x38e   :  { %1902 = vmatprep.subr.mxu1 %v2267_v0 }
 0x38f   :  { %1903 = vmatpush3.msra.mxu1 %v1370_v58 }
 0x390   :  { %1942 = vmatprep.subr.mxu1 %v2267_v0 }
 0x430   :  { %v483_v52 = vpop.f32.mrf.mxu1 }
 0x431   :  { %v484_v53 = vadd.f32 %v1350_v51, %v483_v52  ;;  %v1430_v51 = vld [vmem:[%s3187_s5 + $0x138] sm:$0xff]  ;;  %v1429_v52 = vld [vmem:[%s3187_s5 + $0x130] sm:$0xff] }
 0x432   :  { %v1836_v54 = vpop.f32.mrf.mxu1 }
 0x433   :  { %v487_v55 = vmax.f32 %v484_v53, 0.0  ;;  %v1428_v53 = vld [vmem:[%s3187_s5 + $0x128] sm:$0xff]  ;;  %v1427_v54 = vld [vmem:[%s3187_s5 + $0x120] sm:$0xff] }
 0x435   :  { %1870 = vmatmul.mubr.f32.vlgmr.msra.gmra.mxu0 %v487_v55  ;;  %v1426_v55 = vld [vmem:[%s3187_s5 + $0x118] sm:$0xff] }
 0x436   :  { %1939 = vmatprep.mubr.msk.f32.mxu0 %vm2268_vm0, %v2267_v0  ;;  %1908 = vmatpush3.msk.msra.mxu0 %vm116_vm1, %v1402_v2  ;;  %v1422_v2 = vld [vmem:[#allocation7 + $0x2] ss:$0 sm:$0xff] }
 0x437   :  { %1909 = vmatprep.subr.mxu0 %v2267_v0 }
 0x438   :  { %1910 = vmatpush3.msra.mxu0 %v1401_v3 }
 0x439   :  { %1911 = vmatprep.subr.mxu0 %v2267_v0 }
 0x43a   :  { %1912 = vmatpush3.msra.mxu0 %v1400_v4 }
 0x43b   :  { %1913 = vmatprep.subr.mxu0 %v2267_v0 }
 0x43c   :  { %1914 = vmatpush3.msra.mxu0 %v1399_v5 }
 0x43d   :  { %1915 = vmatprep.subr.mxu0 %v2267_v0 }
 0x43e   :  { %1916 = vmatpush3.msra.mxu0 %v1398_v6 }
 0x43f   :  { %1917 = vmatprep.subr.mxu0 %v2267_v0 }
 0x440   :  { %1918 = vmatpush3.msra.mxu0 %v1397_v7  ;;  %v1455_v7 = vld [vmem:[%s3183_s1 + $0x1f8] sm:$0x3f] }
 0x441   :  { %1919 = vmatprep.subr.mxu0 %v2267_v0 }
 0x442   :  { %1920 = vmatpush3.msra.mxu0 %v1396_v8  ;;  %v1454_v8 = vld [vmem:[%s3183_s1 + $0x1f0] sm:$0xff] }
 0x443   :  { %1921 = vmatprep.subr.mxu0 %v2267_v0 }
 0x444   :  { %1922 = vmatpush3.msra.mxu0 %v1395_v9  ;;  %v1453_v9 = vld [vmem:[%s3183_s1 + $0x1e8] sm:$0xff] }
 0x445   :  { %1923 = vmatprep.subr.mxu0 %v2267_v0 }
 0x446   :  { %1924 = vmatpush3.msra.mxu0 %v1394_v10  ;;  %v1452_v10 = vld [vmem:[%s3183_s1 + $0x1e0] sm:$0xff] }
 0x447   :  { %1925 = vmatprep.subr.mxu0 %v2267_v0 }
 0x448   :  { %1926 = vmatpush3.msra.mxu0 %v1393_v11  ;;  %v1451_v11 = vld [vmem:[%s3183_s1 + $0x1d8] sm:$0xff] }
 0x449   :  { %1927 = vmatprep.subr.mxu0 %v2267_v0 }
 0x44a   :  { %1928 = vmatpush3.msra.mxu0 %v1392_v12  ;;  %v1450_v12 = vld [vmem:[%s3183_s1 + $0x1d0] sm:$0xff] }
 0x44b   :  { %1929 = vmatprep.subr.mxu0 %v2267_v0 }
 0x44c   :  { %1930 = vmatpush3.msra.mxu0 %v1391_v13  ;;  %v1449_v13 = vld [vmem:[%s3183_s1 + $0x1c8] sm:$0xff] }
 0x44d   :  { %1931 = vmatprep.subr.mxu0 %v2267_v0 }
 0x44e   :  { %1932 = vmatpush3.msra.mxu0 %v1390_v14  ;;  %v1448_v14 = vld [vmem:[%s3183_s1 + $0x1c0] sm:$0xff] }
 0x44f   :  { %1933 = vmatprep.subr.mxu0 %v2267_v0 }
 0x450   :  { %1934 = vmatpush3.msra.mxu0 %v1389_v15  ;;  %v1447_v15 = vld [vmem:[%s3183_s1 + $0x1b8] sm:$0xff] }
 0x451   :  { %1935 = vmatprep.subr.mxu0 %v2267_v0 }
 0x452   :  { %1936 = vmatpush3.msra.mxu0 %v1388_v16  ;;  %v1446_v16 = vld [vmem:[%s3183_s1 + $0x1b0] sm:$0xff] }
 0x453   :  { %1937 = vmatprep.subr.mxu0 %v2267_v0 }
 0x454   :  { %1938 = vmatpush3.msra.mxu0 %v1387_v17  ;;  %v1445_v17 = vld [vmem:[%s3183_s1 + $0x1a8] sm:$0xff] }
 0x455   :  { %1977 = vmatprep.subr.mxu0 %v2267_v0 }
 0x4f5   :  { %v579_v60 = vpop.f32.mrf.mxu0 }
 0x4f6   :  { %v580_v61 = vadd.f32 %v1369_v59, %v579_v60 }
 0x4f7   :  { %v1871_v62 = vpop.f32.mrf.mxu0 }
 0x4f8   :  { %v583_v63 = vmax.f32 %v580_v61, 0.0  ;;  %v1425_v61 = vld [vmem:[%s3187_s5 + $0x110] sm:$0xff]  ;;  %v1424_v62 = vld [vmem:[%s3187_s5 + $0x108] sm:$0xff] }
 0x4fa   :  { %1905 = vmatmul.mubr.f32.vlgmr.msra.gmra.mxu1 %v583_v63  ;;  %v1423_v63 = vld [vmem:[%s3187_s5 + $0x100] sm:$0xff] }
 0x4fb   :  { %1974 = vmatprep.mubr.msk.f32.mxu1 %vm2268_vm0, %v2267_v0  ;;  %1943 = vmatpush3.msra.mxu1 %v1421_v19  ;;  %v1443_v19 = vld [vmem:[%s3183_s1 + $0x198] sm:$0xff] }
 0x4fc   :  { %1944 = vmatprep.subr.mxu1 %v2267_v0 }
 0x4fd   :  { %1945 = vmatpush3.msra.mxu1 %v1420_v20  ;;  %v1442_v20 = vld [vmem:[%s3183_s1 + $0x190] sm:$0xff] }
 0x4fe   :  { %1946 = vmatprep.subr.mxu1 %v2267_v0 }
 0x4ff   :  { %1947 = vmatpush3.msra.mxu1 %v1419_v22  ;;  %v1440_v22 = vld [vmem:[%s3183_s1 + $0x180] sm:$0xff] }
 0x500   :  { %1948 = vmatprep.subr.mxu1 %v2267_v0 }
 0x501   :  { %1949 = vmatpush3.msra.mxu1 %v1418_v27  ;;  %v1474_v27 = vld [vmem:[%s3185_s3 + $0x1f8] sm:$0xff] }
 0x502   :  { %1950 = vmatprep.subr.mxu1 %v2267_v0 }
 0x503   :  { %1951 = vmatpush3.msra.mxu1 %v1417_v1  ;;  %v1473_v1 = vld [vmem:[%s3185_s3 + $0x1f0] sm:$0xff] }
 0x504   :  { %1952 = vmatprep.subr.mxu1 %v2267_v0 }
 0x505   :  { %1953 = vmatpush3.msra.mxu1 %v1416_v29 }
 0x506   :  { %1954 = vmatprep.subr.mxu1 %v2267_v0 }
 0x5ba   :  { %v675_v21 = vpop.f32.mrf.mxu1 }
 0x5bb   :  { %v2837_v24 = vadd.f32 %v1386_v18, %v675_v21  ;;  %v1444_v18 = vld [vmem:[%s3183_s1 + $0x1a0] sm:$0xff]  ;;  %v1441_v21 = vld [vmem:[%s3183_s1 + $0x188] sm:$0xff] }
 0x5bc   :  { %v1906_v25 = vpop.f32.mrf.mxu1 }
 0x5bd   :  { %680 = vst [vmem:[#allocation11 + $0x8] sm:$0xff] %v2837_v24  ;;  %v2846_v28 = vsub.f32 %v2644_v26, %v2837_v24  ;;  %v1415_v26 = vld [vmem:[%s3185_s3 + $0x148] sm:$0xff]  ;;  %v1439_v25 = vld [vmem:[#allocation8 + $0x2] ss:$0 sm:$0xff] }
 0x5be   :  { %1955 = vmatpush3.msra.mxu1 %v1415_v26  ;;  %v1472_v26 = vld [vmem:[%s3185_s3 + $0x1e8] sm:$0xff] }
 0x5bf   :  { %684 = vrot.lane.b32.xlu1 %v2846_v28, %s2269_s27  ;;  %1956 = vmatprep.subr.mxu1 %v2267_v0 }
 0x5c0   :  { %1957 = vmatpush3.msra.mxu1 %v1414_v30  ;;  %v681_v30 = vadd.f32 %v2837_v24, %v2635_v23  ;;  %v1470_v23 = vld [vmem:[%s3185_s3 + $0x1d8] sm:$0xff]  ;;  %v1469_v24 = vld [vmem:[%s3185_s3 + $0x1d0] sm:$0xff] }
 0x5c1   :  { %1958 = vmatprep.subr.mxu1 %v2267_v0 }
 0x5c2   :  { %1959 = vmatpush3.msra.mxu1 %v1413_v31 }
 0x5c3   :  { %688 = vrot.lane.b32.xlu1 %v2846_v28, %s2270_s15  ;;  %1960 = vmatprep.subr.mxu1 %v2267_v0 }
 0x5c4   :  { %1961 = vmatpush3.msra.mxu1 %v1412_v32 }
 0x5c5   :  { %1962 = vmatprep.subr.mxu1 %v2267_v0 }
 0x5c6   :  { %1963 = vmatpush3.msra.mxu1 %v1411_v33  ;;  %v1471_v33 = vld [vmem:[%s3185_s3 + $0x1e0] sm:$0xff] }
 0x5c7   :  { %1964 = vmatprep.subr.mxu1 %v2267_v0 }
 0x5c8   :  { %1965 = vmatpush3.msra.mxu1 %v1410_v34 }
 0x5c9   :  { %1966 = vmatprep.subr.mxu1 %v2267_v0 }
 0x5ca   :  { %1967 = vmatpush3.msra.mxu1 %v1409_v35 }
 0x5cb   :  { %1968 = vmatprep.subr.mxu1 %v2267_v0 }
 0x5cc   :  { %1969 = vmatpush3.msra.mxu1 %v1408_v40  ;;  %v1464_v40 = vld [vmem:[%s3185_s3 + $0x1a8] sm:$0xff] }
 0x5cd   :  { %1970 = vmatprep.subr.mxu1 %v2267_v0 }
 0x5ce   :  { %1971 = vmatpush3.msra.mxu1 %v1407_v41  ;;  %v1463_v41 = vld [vmem:[%s3185_s3 + $0x1a0] sm:$0xff] }
 0x5cf   :  { %1972 = vmatprep.subr.mxu1 %v2267_v0 }
 0x5d0   :  { %1973 = vmatpush3.msra.mxu1 %v1406_v42  ;;  %v1462_v42 = vld [vmem:[%s3185_s3 + $0x198] sm:$0xff] }
 0x5d1   :  { %2012 = vmatprep.subr.mxu1 %v2267_v0 }
 0x631   :  { %v685_v36 = vpop.permute.xlu1 %684 }
 0x632   :  { %v687_v37 = vmax.f32 %v2846_v28, %v685_v36 }
 0x635   :  { %v689_v38 = vpop.permute.xlu1 %688 }
 0x636   :  { %v691_v39 = vmax.f32 %v687_v37, %v689_v38  ;;  %v1467_v37 = vld [vmem:[%s3185_s3 + $0x1c0] sm:$0xff]  ;;  %v1466_v38 = vld [vmem:[%s3185_s3 + $0x1b8] sm:$0xff] }
 0x638   :  { %1940 = vmatmul.mubr.msk.f32.vlgmr.msra.gmra.mxu0 %vm112_vm2, %v691_v39  ;;  %v1465_v39 = vld [vmem:[%s3185_s3 + $0x1b0] sm:$0xff] }
 0x639   :  { %2009 = vmatprep.mubr.msk.f32.mxu0 %vm2268_vm0, %v2267_v0  ;;  %1978 = vmatpush3.msra.mxu0 %v1438_v43 }
 0x63a   :  { %1979 = vmatprep.subr.mxu0 %v2267_v0 }
 0x63b   :  { %1980 = vmatpush3.msra.mxu0 %v1437_v44 }
 0x63c   :  { %1981 = vmatprep.subr.mxu0 %v2267_v0 }
 0x63d   :  { %1982 = vmatpush3.msra.mxu0 %v1436_v45 }
 0x63e   :  { %1983 = vmatprep.subr.mxu0 %v2267_v0 }
 0x63f   :  { %1984 = vmatpush3.msra.mxu0 %v1435_v46 }
 0x640   :  { %1985 = vmatprep.subr.mxu0 %v2267_v0 }
 0x641   :  { %1986 = vmatpush3.msra.mxu0 %v1434_v47  ;;  %v1461_v47 = vld [vmem:[%s3185_s3 + $0x190] sm:$0xff] }
 0x642   :  { %1987 = vmatprep.subr.mxu0 %v2267_v0 }
 0x643   :  { %1988 = vmatpush3.msra.mxu0 %v1433_v48  ;;  %v1460_v48 = vld [vmem:[%s3185_s3 + $0x188] sm:$0xff] }
 0x644   :  { %1989 = vmatprep.subr.mxu0 %v2267_v0 }
 0x645   :  { %1990 = vmatpush3.msra.mxu0 %v1432_v49  ;;  %v1459_v49 = vld [vmem:[%s3185_s3 + $0x180] sm:$0xff] }
 0x646   :  { %1991 = vmatprep.subr.mxu0 %v2267_v0 }
 0x647   :  { %1992 = vmatpush3.msra.mxu0 %v1431_v50  ;;  %v1491_v50 = vld [vmem:[%s3187_s5 + $0x1f8] sm:$0xff] }
 0x648   :  { %1993 = vmatprep.subr.mxu0 %v2267_v0 }
 0x649   :  { %1994 = vmatpush3.msra.mxu0 %v1430_v51  ;;  %v1490_v51 = vld [vmem:[%s3187_s5 + $0x1f0] sm:$0xff] }
 0x64a   :  { %1995 = vmatprep.subr.mxu0 %v2267_v0 }
 0x64b   :  { %1996 = vmatpush3.msra.mxu0 %v1429_v52  ;;  %v1489_v52 = vld [vmem:[%s3187_s5 + $0x1e8] sm:$0xff] }
 0x64c   :  { %1997 = vmatprep.subr.mxu0 %v2267_v0 }
 0x64d   :  { %1998 = vmatpush3.msra.mxu0 %v1428_v53  ;;  %v1488_v53 = vld [vmem:[%s3187_s5 + $0x1e0] sm:$0xff] }
 0x64e   :  { %1999 = vmatprep.subr.mxu0 %v2267_v0 }
 0x64f   :  { %2000 = vmatpush3.msra.mxu0 %v1427_v54  ;;  %v1487_v54 = vld [vmem:[%s3187_s5 + $0x1d8] sm:$0xff] }
 0x650   :  { %2001 = vmatprep.subr.mxu0 %v2267_v0 }
 0x651   :  { %2002 = vmatpush3.msra.mxu0 %v1426_v55  ;;  %v1486_v55 = vld [vmem:[%s3187_s5 + $0x1d0] sm:$0xff] }
 0x652   :  { %2003 = vmatprep.subr.mxu0 %v2267_v0 }
 0x653   :  { %2004 = vmatpush3.msra.mxu0 %v1425_v61  ;;  %v1480_v61 = vld [vmem:[%s3187_s5 + $0x1a0] sm:$0xff] }
 0x654   :  { %2005 = vmatprep.subr.mxu0 %v2267_v0 }
 0x655   :  { %2006 = vmatpush3.msra.mxu0 %v1424_v62  ;;  %v1479_v62 = vld [vmem:[%s3187_s5 + $0x198] sm:$0xff] }
 0x656   :  { %2007 = vmatprep.subr.mxu0 %v2267_v0 }
 0x657   :  { %2008 = vmatpush3.msra.mxu0 %v1423_v63  ;;  %v1456_v63 = vld [vmem:[#allocation5 + $0x3] ss:$0 sm:$0xff] }
 0x658   :  { %2047 = vmatprep.subr.mxu0 %v2267_v0 }
 0x6f8   :  { %v789_v57 = vpop.f32.mrf.mxu0 }
 0x6f9   :  { %v790_v58 = vadd.f32 %v1403_v56, %v789_v57  ;;  %v1485_v56 = vld [vmem:[%s3187_s5 + $0x1c8] sm:$0xff]  ;;  %v1484_v57 = vld [vmem:[%s3187_s5 + $0x1c0] sm:$0xff] }
 0x6fa   :  { %v1941_v59 = vpop.f32.mrf.mxu0 }
 0x6fb   :  { %v793_v60 = vmax.f32 %v790_v58, 0.0  ;;  %v1483_v58 = vld [vmem:[%s3187_s5 + $0x1b8] sm:$0xff]  ;;  %v1482_v59 = vld [vmem:[%s3187_s5 + $0x1b0] sm:$0xff] }
 0x6fd   :  { %1975 = vmatmul.mubr.f32.vlgmr.msra.gmra.mxu1 %v793_v60  ;;  %v1481_v60 = vld [vmem:[%s3187_s5 + $0x1a8] sm:$0xff] }
 0x6fe   :  { %2044 = vmatprep.mubr.msk.f32.mxu1 %vm2268_vm0, %v2267_v0  ;;  %2013 = vmatpush3.msk.msra.mxu1 %vm116_vm1, %v1455_v7  ;;  %v1477_v7 = vld [vmem:[%s3187_s5 + $0x188] sm:$0xff] }
 0x6ff   :  { %2014 = vmatprep.subr.mxu1 %v2267_v0 }
 0x700   :  { %2015 = vmatpush3.msra.mxu1 %v1454_v8  ;;  %v1476_v8 = vld [vmem:[%s3187_s5 + $0x180] sm:$0xff] }
 0x701   :  { %2016 = vmatprep.subr.mxu1 %v2267_v0 }
 0x702   :  { %2017 = vmatpush3.msra.mxu1 %v1453_v9  ;;  %v1475_v9 = vld [vmem:[#allocation7 + $0x3] ss:$0 sm:$0xff] }
 0x703   :  { %2018 = vmatprep.subr.mxu1 %v2267_v0 }
 0x704   :  { %2019 = vmatpush3.msra.mxu1 %v1452_v10 }
 0x705   :  { %2020 = vmatprep.subr.mxu1 %v2267_v0 }
 0x706   :  { %2021 = vmatpush3.msra.mxu1 %v1451_v11 }
 0x707   :  { %2022 = vmatprep.subr.mxu1 %v2267_v0 }
 0x708   :  { %2023 = vmatpush3.msra.mxu1 %v1450_v12 }
 0x709   :  { %2024 = vmatprep.subr.mxu1 %v2267_v0 }
 0x70a   :  { %2025 = vmatpush3.msra.mxu1 %v1449_v13 }
 0x70b   :  { %2026 = vmatprep.subr.mxu1 %v2267_v0 }
 0x70c   :  { %2027 = vmatpush3.msra.mxu1 %v1448_v14  ;;  %v1492_v14 = vld [vmem:[#allocation8 + $0x3] ss:$0 sm:$0xff] }
 0x70d   :  { %2028 = vmatprep.subr.mxu1 %v2267_v0 }
 0x70e   :  { %2029 = vmatpush3.msra.mxu1 %v1447_v15 }
 0x70f   :  { %2030 = vmatprep.subr.mxu1 %v2267_v0 }
 0x710   :  { %2031 = vmatpush3.msra.mxu1 %v1446_v16 }
 0x711   :  { %2032 = vmatprep.subr.mxu1 %v2267_v0 }
 0x712   :  { %2033 = vmatpush3.msra.mxu1 %v1445_v17 }
 0x713   :  { %2034 = vmatprep.subr.mxu1 %v2267_v0 }
 0x714   :  { %2035 = vmatpush3.msra.mxu1 %v1444_v18 }
 0x715   :  { %2036 = vmatprep.subr.mxu1 %v2267_v0 }
 0x716   :  { %2037 = vmatpush3.msra.mxu1 %v1443_v19 }
 0x717   :  { %2038 = vmatprep.subr.mxu1 %v2267_v0 }
 0x718   :  { %2039 = vmatpush3.msra.mxu1 %v1442_v20 }
 0x719   :  { %2040 = vmatprep.subr.mxu1 %v2267_v0 }
 0x71a   :  { %2041 = vmatpush3.msra.mxu1 %v1441_v21 }
 0x71b   :  { %2042 = vmatprep.subr.mxu1 %v2267_v0 }
 0x71c   :  { %2043 = vmatpush3.msra.mxu1 %v1440_v22 }
 0x71d   :  { %2082 = vmatprep.subr.mxu1 %v2267_v0 }
 0x7bd   :  { %v885_v3 = vpop.f32.mrf.mxu1 }
 0x7be   :  { %v886_v4 = vadd.f32 %v1422_v2, %v885_v3 }
 0x7bf   :  { %v1976_v5 = vpop.f32.mrf.mxu1 }
 0x7c0   :  { %v889_v6 = vmax.f32 %v886_v4, 0.0 }
 0x7c2   :  { %2010 = vmatmul.mubr.f32.vlgmr.msra.gmra.mxu0 %v889_v6  ;;  %v1478_v6 = vld [vmem:[%s3187_s5 + $0x190] sm:$0xff]  ;;  %s2211_s5 = scalar_lea.vmem %s1312_s10, 512 }
 0x7c3   :  { %2079 = vmatprep.mubr.msk.f32.mxu0 %vm2268_vm0, %v2267_v0  ;;  %2048 = vmatpush3.msra.mxu0 %v1474_v27  ;;  %p2212_p6 = scmp.ne.s32.totalorder %s1312_s10, %s2211_s5  ;;  %p2217_p8 = scmp.lt.s32.totalorder %s2211_s5, %s2211_s5 }
 0x7c4   :  { %2049 = vmatprep.subr.mxu0 %v2267_v0 }
 0x7c5   :  { %2050 = vmatpush3.msra.mxu0 %v1473_v1  ;;  %p2218_p9 = por %p2217_p8, %p2216_p7 }
 0x7c6   :  { %2051 = vmatprep.subr.mxu0 %v2267_v0 }
 0x7c7   :  { %2052 = vmatpush3.msra.mxu0 %v1472_v26  ;;  %p2219_p10 = pnand %p2218_p9, %p2212_p6 }
 0x7c8   :  { %2053 = vmatprep.subr.mxu0 %v2267_v0 }
 0x7c9   :  { %2054 = vmatpush3.msra.mxu0 %v1471_v33 }
 0x7ca   :  { %2055 = vmatprep.subr.mxu0 %v2267_v0 }
 0x7cb   :  { %2056 = vmatpush3.msra.mxu0 %v1470_v23 }
 0x7cc   :  { %2057 = vmatprep.subr.mxu0 %v2267_v0 }
 0x7cd   :  { %2058 = vmatpush3.msra.mxu0 %v1469_v24 }
 0x7ce   :  { %2059 = vmatprep.subr.mxu0 %v2267_v0 }
 0x882   :  { %v981_v29 = vpop.f32.mrf.mxu0 }
 0x883   :  { %v982_v31 = vadd.f32 %v1439_v25, %v981_v29 }
 0x884   :  { %v2011_v32 = vpop.f32.mrf.mxu0 }
 0x885   :  { %986 = vst [vmem:[#allocation11 + $0x10] sm:$0xff] %v982_v31  ;;  %v988_v34 = vmul.f32 0.5, %v982_v31  ;;  %v3055_v35 = vadd.f32 %v982_v31, %v681_v30 }
 0x887   :  { %v989_v36 = vsub.f32 %v2846_v28, %v988_v34  ;;  %v1468_v28 = vld [vmem:[%s3185_s3 + $0x1c8] sm:$0xff]  ;;  %s2272_s3 = smov [#allocation10]  }
 0x888   :  { %2060 = vmatpush3.msra.mxu0 %v1468_v28  ;;  %s1302_s11 = sshll.u32 %s2272_s3, 4  ;;  %s1303_s11 = int_to_ptr.vmem [resolvable:$true] %s1302_s11 }
 0x889   :  { %995 = vrot.lane.b32.xlu1 %v989_v36, %s2270_s15  ;;  %991 = vrot.lane.b32.xlu0 %v989_v36, %s2269_s27 }
 0x88a   :  { %2061 = vmatprep.subr.mxu0 %v2267_v0 }
 0x88b   :  { %2062 = vmatpush3.msra.mxu0 %v1467_v37 }
 0x88c   :  { %2063 = vmatprep.subr.mxu0 %v2267_v0 }
 0x88d   :  { %2064 = vmatpush3.msra.mxu0 %v1466_v38 }
 0x88e   :  { %2065 = vmatprep.subr.mxu0 %v2267_v0 }
 0x88f   :  { %2066 = vmatpush3.msra.mxu0 %v1465_v39 }
 0x890   :  { %2067 = vmatprep.subr.mxu0 %v2267_v0 }
 0x891   :  { %2068 = vmatpush3.msra.mxu0 %v1464_v40 }
 0x892   :  { %2069 = vmatprep.subr.mxu0 %v2267_v0 }
 0x893   :  { %2070 = vmatpush3.msra.mxu0 %v1463_v41 }
 0x894   :  { %2071 = vmatprep.subr.mxu0 %v2267_v0 }
 0x895   :  { %2072 = vmatpush3.msra.mxu0 %v1462_v42 }
 0x896   :  { %2073 = vmatprep.subr.mxu0 %v2267_v0 }
 0x897   :  { %2074 = vmatpush3.msra.mxu0 %v1461_v47 }
 0x898   :  { %2075 = vmatprep.subr.mxu0 %v2267_v0 }
 0x899   :  { %2076 = vmatpush3.msra.mxu0 %v1460_v48 }
 0x89a   :  { %2077 = vmatprep.subr.mxu0 %v2267_v0 }
 0x89b   :  { %2078 = vmatpush3.msra.mxu0 %v1459_v49 }
 0x8fb   :  { %v992_v43 = vpop.permute.xlu0 %991  ;;  %v996_v45 = vpop.permute.xlu1 %995 }
 0x8fc   :  { %v994_v44 = vmax.f32 %v989_v36, %v992_v43 }
 0x8fe   :  { %v998_v46 = vmax.f32 %v994_v44, %v996_v45 }
 0x900   :  { %2045 = vmatmul.mubr.msk.f32.vlgmr.msra.gmra.mxu1 %vm112_vm2, %v998_v46 }
 0x901   :  { %2114 = vmatprep.mubr.msk.f32.mxu1 %vm2268_vm0, %v2267_v0  ;;  %2083 = vmatpush3.msra.mxu1 %v1491_v50 }
 0x902   :  { %2084 = vmatprep.subr.mxu1 %v2267_v0 }
 0x903   :  { %2085 = vmatpush3.msra.mxu1 %v1490_v51 }
 0x904   :  { %2086 = vmatprep.subr.mxu1 %v2267_v0 }
 0x905   :  { %2087 = vmatpush3.msra.mxu1 %v1489_v52 }
 0x906   :  { %2088 = vmatprep.subr.mxu1 %v2267_v0 }
 0x907   :  { %2089 = vmatpush3.msra.mxu1 %v1488_v53 }
 0x908   :  { %2090 = vmatprep.subr.mxu1 %v2267_v0 }
 0x909   :  { %2091 = vmatpush3.msra.mxu1 %v1487_v54 }
 0x90a   :  { %2092 = vmatprep.subr.mxu1 %v2267_v0 }
 0x90b   :  { %2093 = vmatpush3.msra.mxu1 %v1486_v55 }
 0x90c   :  { %2094 = vmatprep.subr.mxu1 %v2267_v0 }
 0x90d   :  { %2095 = vmatpush3.msra.mxu1 %v1485_v56 }
 0x90e   :  { %2096 = vmatprep.subr.mxu1 %v2267_v0 }
 0x90f   :  { %2097 = vmatpush3.msra.mxu1 %v1484_v57 }
 0x910   :  { %2098 = vmatprep.subr.mxu1 %v2267_v0 }
 0x911   :  { %2099 = vmatpush3.msra.mxu1 %v1483_v58 }
 0x912   :  { %2100 = vmatprep.subr.mxu1 %v2267_v0 }
 0x913   :  { %2101 = vmatpush3.msra.mxu1 %v1482_v59 }
 0x914   :  { %2102 = vmatprep.subr.mxu1 %v2267_v0 }
 0x915   :  { %2103 = vmatpush3.msra.mxu1 %v1481_v60 }
 0x916   :  { %2104 = vmatprep.subr.mxu1 %v2267_v0 }
 0x917   :  { %2105 = vmatpush3.msra.mxu1 %v1480_v61 }
 0x918   :  { %2106 = vmatprep.subr.mxu1 %v2267_v0 }
 0x919   :  { %2107 = vmatpush3.msra.mxu1 %v1479_v62 }
 0x91a   :  { %2108 = vmatprep.subr.mxu1 %v2267_v0 }
 0x91b   :  { %2109 = vmatpush3.msra.mxu1 %v1478_v6 }
 0x91c   :  { %2110 = vmatprep.subr.mxu1 %v2267_v0 }
 0x91d   :  { %2111 = vmatpush3.msra.mxu1 %v1477_v7 }
 0x91e   :  { %2112 = vmatprep.subr.mxu1 %v2267_v0 }
 0x91f   :  { %2113 = vmatpush3.msra.mxu1 %v1476_v8 }
 0x9c0   :  { %v1096_v2 = vpop.f32.mrf.mxu1 }
 0x9c1   :  { %v1097_v3 = vadd.f32 %v1456_v63, %v1096_v2 }
 0x9c2   :  { %v2046_v4 = vpop.f32.mrf.mxu1 }
 0x9c3   :  { %v1100_v5 = vmax.f32 %v1097_v3, 0.0 }
 0x9c5   :  { %2080 = vmatmul.mubr.f32.vlgmr.msra.gmra.mxu0 %v1100_v5 }
 0xa85   :  { %v1192_v10 = vpop.f32.mrf.mxu0 }
 0xa86   :  { %v1193_v11 = vadd.f32 %v1475_v9, %v1192_v10 }
 0xa87   :  { %v2081_v12 = vpop.f32.mrf.mxu0 }
 0xa88   :  { %v1196_v13 = vmax.f32 %v1193_v11, 0.0 }
 0xa8a   :  { %2115 = vmatmul.mubr.f32.vlgmr.msra.gmra.mxu1 %v1196_v13 }
 0xb4a   :  { %v1288_v15 = vpop.f32.mrf.mxu1 }
 0xb4b   :  { %v1289_v16 = vadd.f32 %v1492_v14, %v1288_v15 }
 0xb4c   :  { %v2116_v0 = vpop.f32.mrf.mxu1 }
 0xb4d   :  { %1293 = vst [vmem:[#allocation11 + $0x18] sm:$0xff] %v1289_v16  ;;  %v1294_v17 = vadd.f32 %v1289_v16, %v3055_v35 }
 0xb4e   :  { %2222 = shalt.err (!%p2219_p10)
}
 0xb4f   :  { %s2273_s12 = smov 128   ;;  %s2274_s13 = smov 8   ;;  %1295 = vst [vmem:[#allocation10] sm:$0xff] %v1294_v17 }
 0xb50   :  { %1317 = dma.vmem_to_hbm [thread:$0]  %s1312_s10, 512, %s3190_s8, [#allocation12], %s2273_s12, %s2273_s12, %s2274_s13  }
 0xb51   :  { %s2231_s27 = scalar_lea.vmem %s1303_s11, 128  ;;  %p2236_p12 = scmp.lt.s32.totalorder %s1303_s11, %s1303_s11 }
 0xb52   :  { %p2232_p11 = scmp.ne.s32.totalorder %s1303_s11, %s2231_s27  ;;  %p2237_p13 = scmp.lt.s32.totalorder %s2231_s27, %s2231_s27 }
 0xb54   :  { %p2238_p0 = por %p2237_p13, %p2236_p12 }
 0xb56   :  { %p2239_p1 = pnand %p2238_p0, %p2232_p11 }
 0xb58   :  { %2242 = shalt.err (!%p2239_p1)
}
 0xb59   :  { %1305 = dma.vmem_to_hbm [thread:$0]  %s1303_s11, 128, %s3189_s7, [#allocation4]  }
 0xb5a   :  { %2257 = dma.done.wait [#allocation4], 128  }
 0xb5b   :  { %2258 = vsyncadd [#allocation4], 4294967168 }
 0xb5c   :  { %2259 = dma.done.wait [#allocation12], 512  }
 0xb5d   :  { %2260 = vsyncadd [#allocation12], 4294966784 }
 0xb5e   :  { %1324 = vsyncpa [#allocation3], 1 }
 0xb5f   :  { %1325 = vsyncpa [#allocation6], 1 }
 0xb60   :  { %1326 = vsyncpa [#allocation9], 1 }
 0xb61   :  { %1327 = vsyncpa [#allocation4], 1 }
 0xb62   :  { %1328 = vsyncpa [#allocation12], 1 }

</bundles_post_ra>
